<compile_context>
chip_gen: v6e
topology: v6e:2x2x1
jax: 0.10.0
libtpu: 0.0.40
codegen_flags: <defaults>
</compile_context>

<pallas_src>
import math
import functools

import numpy as np
import jax
import jax.numpy as jnp
from jax.experimental import pallas as pl
from jax.experimental.pallas import tpu as pltpu


def encoder_block_kernel(
    x_ref,        # (1, S, H)  f32   activation tile for this batch
    maskq_ref,    # (1, S, 1)  f32   1.0 for <PAD> (query rows)
    maskk_ref,    # (1, 1, S)  f32   1.0 for <PAD> (key columns)
    wqkv_ref,     # (H, 3H)    bf16  [wq*1/sqrt(dk) | wk | wv]
    wo_ref,       # (H, H)     bf16
    w1_ref, b1_ref,   # (H, F) bf16, (1, F) f32
    w2_ref, b2_ref,   # (F, H) bf16, (1, H) f32
    g1_ref, be1_ref, g2_ref, be2_ref,   # (1, H) f32 LayerNorm params
    o_ref,        # (1, S, H)  f32
    *, n_head: int,
):
    S = x_ref.shape[1]
    H = x_ref.shape[2]
    dk = H // n_head

    x = x_ref[0]                                            # (S, H) f32

    # Hoisted masks, built once and reused (JAX does not CSE broadcasts).
    q_pad = maskq_ref[0] > 0.5                              # (S, 1) bool
    neg_key = maskk_ref[0] * jnp.float32(-1e30)             # (1, S) additive mask

    # ---- fused QKV projection: one bf16 MXU matmul, f32 accumulation --------
    x_bf = x.astype(jnp.bfloat16)
    qkv = jnp.dot(x_bf, wqkv_ref[...],
                  preferred_element_type=jnp.float32)       # (S, 3H) f32
    # 1/sqrt(dk) is pre-folded into the Q columns of wqkv (wrapper side).
    q = qkv[:, 0 * H:1 * H].reshape(S, n_head, dk).astype(jnp.bfloat16)
    k = qkv[:, 1 * H:2 * H].reshape(S, n_head, dk).astype(jnp.bfloat16)
    v = qkv[:, 2 * H:3 * H].reshape(S, n_head, dk).astype(jnp.bfloat16)

    # ---- batched multi-head attention (single contraction over all heads) ---
    scores = jnp.einsum('ihd,jhd->hij', q, k,
                        preferred_element_type=jnp.float32)  # (NH, S, S) f32
    scores = scores + neg_key[None, :, :]                    # mask <PAD> keys

    m = jnp.max(scores, axis=-1, keepdims=True)
    p = jnp.exp(scores - m)
    denom = jnp.sum(p, axis=-1, keepdims=True)
    p = p * pl.reciprocal(denom, approx=True)                # divide on the EUP

    ctx = jnp.einsum('hij,jhd->ihd', p.astype(jnp.bfloat16), v,
                     preferred_element_type=jnp.float32)     # (S, NH, dk) f32
    attn = ctx.reshape(S, H)
    attn = jnp.where(q_pad, 0.0, attn)                       # zero <PAD> queries

    attn = jnp.dot(attn.astype(jnp.bfloat16), wo_ref[...],
                   preferred_element_type=jnp.float32)       # (S, H)

    # ---- residual + LayerNorm 1 (f32) ----  (dropout1 = identity)
    h1 = attn + x
    mu = jnp.mean(h1, axis=-1, keepdims=True)
    var = jnp.mean(jnp.square(h1 - mu), axis=-1, keepdims=True)
    h1 = (h1 - mu) * jax.lax.rsqrt(var + 1e-5)
    h1 = h1 * g1_ref[...] + be1_ref[...]

    # ---- feed-forward (bf16 matmuls, f32 bias/accum) ----  (dropout2 = identity)
    f = jnp.dot(h1.astype(jnp.bfloat16), w1_ref[...],
                preferred_element_type=jnp.float32) + b1_ref[...]
    f = jnp.maximum(f, 0.0)
    f = jnp.dot(f.astype(jnp.bfloat16), w2_ref[...],
                preferred_element_type=jnp.float32) + b2_ref[...]
    h2 = f + h1

    # ---- LayerNorm 2 (f32) ----
    mu2 = jnp.mean(h2, axis=-1, keepdims=True)
    var2 = jnp.mean(jnp.square(h2 - mu2), axis=-1, keepdims=True)
    h2 = (h2 - mu2) * jax.lax.rsqrt(var2 + 1e-5)
    h2 = h2 * g2_ref[...] + be2_ref[...]

    # ---- zero <PAD> positions (output[padding_mask] = 0) ----
    # NOTE: for real configs H should be a multiple of 128 so this store is
    # lane-dense; at H=32 the masked store cost is negligible.
    o_ref[0] = jnp.where(q_pad, 0.0, h2)


def transformer_encoder_block(x, padding_mask, params, n_head):
    S, B, H = x.shape
    dk = H // n_head

    # Batch-major layout so the grid axis (batch) is independent / "parallel".
    x_bm = jnp.transpose(x, (1, 0, 2))                       # (B, S, H)
    maskf = jnp.transpose(padding_mask.astype(jnp.float32), (1, 0))  # (B, S)
    maskq = maskf[:, :, None]                                # (B, S, 1)
    maskk = maskf[:, None, :]                                # (B, 1, S)

    # Fused QKV weight with the attention scale folded into the Q columns;
    # all matmul weights cast to bf16 for the MXU (halves weight DMA bytes).
    wq_scaled = params['wq'] * jnp.float32(1.0 / math.sqrt(dk))
    wqkv = jnp.concatenate([wq_scaled, params['wk'], params['wv']],
                           axis=1).astype(jnp.bfloat16)      # (H, 3H)
    wo = params['wo'].astype(jnp.bfloat16)
    w1 = params['w1'].astype(jnp.bfloat16)
    w2 = params['w2'].astype(jnp.bfloat16)
    b1, b2 = params['b1'], params['b2']
    g1, be1, g2, be2 = params['g1'], params['be1'], params['g2'], params['be2']

    # Weights: full-extent block + constant index_map -> DMA'd once, resident
    # across all grid steps.
    def resident(a):
        return pl.BlockSpec(a.shape, lambda b: (0,) * a.ndim)

    in_specs = [
        pl.BlockSpec((1, S, H), lambda b: (b, 0, 0)),        # x (per-batch tile)
        pl.BlockSpec((1, S, 1), lambda b: (b, 0, 0)),        # query pad mask
        pl.BlockSpec((1, 1, S), lambda b: (b, 0, 0)),        # key pad mask
        resident(wqkv), resident(wo),
        resident(w1), resident(b1), resident(w2), resident(b2),
        resident(g1), resident(be1), resident(g2), resident(be2),
    ]
    out_specs = pl.BlockSpec((1, S, H), lambda b: (b, 0, 0))

    kernel = functools.partial(encoder_block_kernel, n_head=n_head)
    out_bm = pl.pallas_call(
        kernel,
        out_shape=jax.ShapeDtypeStruct((B, S, H), jnp.float32),
        grid=(B,),
        in_specs=in_specs,
        out_specs=out_specs,
        compiler_params=pltpu.CompilerParams(
            dimension_semantics=("parallel",),               # shard batches across TCs
            vmem_limit_bytes=32 * 1024 * 1024),
    )(x_bm, maskq, maskk, wqkv, wo, w1, b1, w2, b2, g1, be1, g2, be2)

    return jnp.transpose(out_bm, (1, 0, 2))                  # back to (S, B, H)


def reference(x, padding_mask, params, n_head):
    """Pure-JAX f32 reference mirroring the PyTorch forward (dropout = identity)."""
    S, B, H = x.shape
    dk = H // n_head
    xf = x.reshape(S * B, H)
    q = xf @ params['wq']
    k = xf @ params['wk']
    v = xf @ params['wv']
    q3 = q.reshape(S, B * n_head, dk)
    k3 = k.reshape(S, B * n_head, dk)
    v3 = v.reshape(S, B * n_head, dk)
    mask_rep = jnp.repeat(padding_mask, n_head, axis=1)          # (S, B*nh)
    scores = jnp.einsum('igd,jgd->gij', q3, k3) / math.sqrt(dk)  # (G,S,S)
    scores = jnp.where(mask_rep.T[:, None, :], -jnp.inf, scores)
    p = jax.nn.softmax(scores, axis=-1)
    attn = jnp.einsum('gij,jgd->igd', p, v3)                     # (S,G,dk)
    attn = jnp.where(mask_rep[:, :, None], 0.0, attn)
    attn = attn.reshape(S, B, H) @ params['wo']

    def ln(z, g, b):
        mu = jnp.mean(z, axis=-1, keepdims=True)
        var = jnp.mean((z - mu) ** 2, axis=-1, keepdims=True)
        return (z - mu) / jnp.sqrt(var + 1e-5) * g.reshape(1, 1, -1) + b.reshape(1, 1, -1)

    h1 = ln(attn + x, params['g1'], params['be1'])
    f = jnp.maximum(h1.reshape(S * B, H) @ params['w1'] + params['b1'], 0.0)
    f = (f @ params['w2'] + params['b2']).reshape(S, B, H)
    h2 = ln(f + h1, params['g2'], params['be2'])
    return jnp.where(padding_mask[:, :, None], 0.0, h2)


def init_params(key, H, n_head, F):
    ks = jax.random.split(key, 8)

    def lin_w(k, fan_in, fan_out):
        bound = 1.0 / math.sqrt(fan_in)
        return jax.random.uniform(k, (fan_in, fan_out), jnp.float32, -bound, bound)

    def lin_b(k, fan_in, fan_out):
        bound = 1.0 / math.sqrt(fan_in)
        return jax.random.uniform(k, (1, fan_out), jnp.float32, -bound, bound)

    return {
        'wq': lin_w(ks[0], H, H),
        'wk': lin_w(ks[1], H, H),
        'wv': lin_w(ks[2], H, H),
        'wo': lin_w(ks[3], H, H),
        'w1': lin_w(ks[4], H, F),
        'b1': lin_b(ks[5], H, F),
        'w2': lin_w(ks[6], F, H),
        'b2': lin_b(ks[7], F, H),
        # LayerNorm default init: weight = 1, bias = 0
        'g1': jnp.ones((1, H), jnp.float32),
        'be1': jnp.zeros((1, H), jnp.float32),
        'g2': jnp.ones((1, H), jnp.float32),
        'be2': jnp.zeros((1, H), jnp.float32),
    }


if __name__ == "__main__":
    S, B, H, NH, F = 8, 2, 32, 4, 64   # seq, batch, hidden, heads, feed_forward_dim

    key = jax.random.PRNGKey(0)
    k_x, k_p = jax.random.split(key)

    x = jax.random.normal(k_x, (S, B, H), jnp.float32)
    # padding: last position of batch 0 and last two of batch 1 are <PAD>
    padding_mask = jnp.zeros((S, B), dtype=bool)
    padding_mask = padding_mask.at[S - 1, 0].set(True)
    padding_mask = padding_mask.at[S - 2:, 1].set(True)
    # the module asserts that <PAD> rows of x are exactly zero
    x = jnp.where(padding_mask[:, :, None], 0.0, x)

    params = init_params(k_p, H, NH, F)

    out = transformer_encoder_block(x, padding_mask, params, NH)
    out = jax.block_until_ready(out)

    ref = reference(x, padding_mask, params, NH)
    # bf16 MXU matmuls (f32 accumulation) + approx reciprocal -> loosen vs f32 ref.
    assert np.allclose(np.asarray(out), np.asarray(ref), atol=2e-2, rtol=2e-2)
    print("KERNEL_OK")
</pallas_src>

<mosaic_0001>
module attributes {stable_mosaic.version = 11 : i64} {
  func.func @encoder_block_kernel(%arg0: i32, %arg1: memref<1x8x32xf32, #tpu.memory_space<vmem>>, %arg2: memref<1x8x1xf32, #tpu.memory_space<vmem>>, %arg3: memref<1x1x8xf32, #tpu.memory_space<vmem>>, %arg4: memref<32x96xbf16, #tpu.memory_space<vmem>>, %arg5: memref<32x32xbf16, #tpu.memory_space<vmem>>, %arg6: memref<32x64xbf16, #tpu.memory_space<vmem>>, %arg7: memref<1x64xf32, #tpu.memory_space<vmem>>, %arg8: memref<64x32xbf16, #tpu.memory_space<vmem>>, %arg9: memref<1x32xf32, #tpu.memory_space<vmem>>, %arg10: memref<1x32xf32, #tpu.memory_space<vmem>>, %arg11: memref<1x32xf32, #tpu.memory_space<vmem>>, %arg12: memref<1x32xf32, #tpu.memory_space<vmem>>, %arg13: memref<1x32xf32, #tpu.memory_space<vmem>>, %arg14: memref<1x8x32xf32, #tpu.memory_space<vmem>>) attributes {dimension_semantics = [#tpu.dimension_semantics<parallel>], iteration_bounds = array<i64: 2>, scalar_prefetch = 0 : i64, scratch_operands = 0 : i64, tpu.core_type = #tpu.core_type<tc>, window_params = [{transform_indices = @transform_0, window_bounds = array<i64: 1, 8, 32>}, {transform_indices = @transform_1, window_bounds = array<i64: 1, 8, 1>}, {transform_indices = @transform_2, window_bounds = array<i64: 1, 1, 8>}, {pipeline_mode = #tpu.pipeline_mode<synchronous>, transform_indices = @transform_3, window_bounds = array<i64: 32, 96>}, {pipeline_mode = #tpu.pipeline_mode<synchronous>, transform_indices = @transform_4, window_bounds = array<i64: 32, 32>}, {pipeline_mode = #tpu.pipeline_mode<synchronous>, transform_indices = @transform_5, window_bounds = array<i64: 32, 64>}, {pipeline_mode = #tpu.pipeline_mode<synchronous>, transform_indices = @transform_6, window_bounds = array<i64: 1, 64>}, {pipeline_mode = #tpu.pipeline_mode<synchronous>, transform_indices = @transform_7, window_bounds = array<i64: 64, 32>}, {pipeline_mode = #tpu.pipeline_mode<synchronous>, transform_indices = @transform_8, window_bounds = array<i64: 1, 32>}, {pipeline_mode = #tpu.pipeline_mode<synchronous>, transform_indices = @transform_9, window_bounds = array<i64: 1, 32>}, {pipeline_mode = #tpu.pipeline_mode<synchronous>, transform_indices = @transform_10, window_bounds = array<i64: 1, 32>}, {pipeline_mode = #tpu.pipeline_mode<synchronous>, transform_indices = @transform_11, window_bounds = array<i64: 1, 32>}, {pipeline_mode = #tpu.pipeline_mode<synchronous>, transform_indices = @transform_12, window_bounds = array<i64: 1, 32>}, {transform_indices = @transform_13, window_bounds = array<i64: 1, 8, 32>}]} {
    %c0 = arith.constant 0 : index
    %c0_0 = arith.constant 0 : index
    %c0_1 = arith.constant 0 : index
    %0 = vector.load %arg1[%c0, %c0_0, %c0_1] : memref<1x8x32xf32, #tpu.memory_space<vmem>>, vector<1x8x32xf32>
    %1 = vector.shape_cast %0 : vector<1x8x32xf32> to vector<8x32xf32>
    %c0_2 = arith.constant 0 : index
    %c0_3 = arith.constant 0 : index
    %c0_4 = arith.constant 0 : index
    %2 = vector.load %arg2[%c0_2, %c0_3, %c0_4] : memref<1x8x1xf32, #tpu.memory_space<vmem>>, vector<1x8x1xf32>
    %3 = vector.shape_cast %2 : vector<1x8x1xf32> to vector<8x1xf32>
    %cst = arith.constant 5.000000e-01 : f32
    %4 = vector.broadcast %cst : f32 to vector<8x1xf32>
    %5 = arith.cmpf ogt, %3, %4 : vector<8x1xf32>
    %c0_5 = arith.constant 0 : index
    %c0_6 = arith.constant 0 : index
    %c0_7 = arith.constant 0 : index
    %6 = vector.load %arg3[%c0_5, %c0_6, %c0_7] : memref<1x1x8xf32, #tpu.memory_space<vmem>>, vector<1x1x8xf32>
    %7 = vector.shape_cast %6 : vector<1x1x8xf32> to vector<1x8xf32>
    %cst_8 = arith.constant -1.000000e+30 : f32
    %8 = vector.broadcast %cst_8 : f32 to vector<1x8xf32>
    %9 = arith.mulf %7, %8 : vector<1x8xf32>
    %10 = arith.truncf %1 : vector<8x32xf32> to vector<8x32xbf16>
    %c0_9 = arith.constant 0 : index
    %c0_10 = arith.constant 0 : index
    %11 = vector.load %arg4[%c0_9, %c0_10] : memref<32x96xbf16, #tpu.memory_space<vmem>>, vector<32x96xbf16>
    %cst_11 = arith.constant dense<0.000000e+00> : vector<8x96xf32>
    %12 = tpu.matmul %10, %11, %cst_11 {dimension_numbers = #tpu.dot_dimension_numbers<[1], [0], [0], [1], [0, 0, 1, 1], [], []>} : vector<8x32xbf16>, vector<32x96xbf16>, vector<8x96xf32> -> vector<8x96xf32>
    %13 = vector.extract_strided_slice %12 {offsets = [0, 0], sizes = [8, 32], strides = [1, 1]} : vector<8x96xf32> to vector<8x32xf32>
    %14 = vector.shape_cast %13 : vector<8x32xf32> to vector<8x4x8xf32>
    %15 = arith.truncf %14 : vector<8x4x8xf32> to vector<8x4x8xbf16>
    %16 = vector.extract_strided_slice %12 {offsets = [0, 32], sizes = [8, 32], strides = [1, 1]} : vector<8x96xf32> to vector<8x32xf32>
    %17 = vector.shape_cast %16 : vector<8x32xf32> to vector<8x4x8xf32>
    %18 = arith.truncf %17 : vector<8x4x8xf32> to vector<8x4x8xbf16>
    %19 = vector.extract_strided_slice %12 {offsets = [0, 64], sizes = [8, 32], strides = [1, 1]} : vector<8x96xf32> to vector<8x32xf32>
    %20 = vector.shape_cast %19 : vector<8x32xf32> to vector<8x4x8xf32>
    %21 = arith.truncf %20 : vector<8x4x8xf32> to vector<8x4x8xbf16>
    "tpu.trace_start"() <{level = 10 : i32, message = "ihd,jhd->hij"}> : () -> ()
    %cst_12 = arith.constant dense<0.000000e+00> : vector<4x8x8xf32>
    %22 = tpu.matmul %15, %18, %cst_12 {dimension_numbers = #tpu.dot_dimension_numbers<[2], [2], [0], [0], [0, 1, 0, 0, 1, 0], [1], [1]>} : vector<8x4x8xbf16>, vector<8x4x8xbf16>, vector<4x8x8xf32> -> vector<4x8x8xf32>
    "tpu.trace_stop"() : () -> ()
    %23 = vector.shape_cast %9 : vector<1x8xf32> to vector<1x1x8xf32>
    %24 = vector.broadcast %23 : vector<1x1x8xf32> to vector<4x8x8xf32>
    %25 = arith.addf %22, %24 : vector<4x8x8xf32>
    %cst_13 = arith.constant dense<0xFF800000> : vector<4x8xf32>
    %26 = vector.multi_reduction <maximumf>, %25, %cst_13 [2] : vector<4x8x8xf32> to vector<4x8xf32>
    %27 = vector.shape_cast %26 : vector<4x8xf32> to vector<4x8x1xf32>
    %28 = vector.broadcast %27 : vector<4x8x1xf32> to vector<4x8x8xf32>
    %29 = arith.subf %25, %28 : vector<4x8x8xf32>
    %30 = math.exp %29 : vector<4x8x8xf32>
    %cst_14 = arith.constant dense<0.000000e+00> : vector<4x8xf32>
    %31 = vector.multi_reduction <add>, %30, %cst_14 [2] : vector<4x8x8xf32> to vector<4x8xf32>
    %32 = vector.shape_cast %31 : vector<4x8xf32> to vector<4x8x1xf32>
    %33 = tpu.reciprocal %32 {approx = true} : vector<4x8x1xf32> -> vector<4x8x1xf32>
    %34 = vector.broadcast %33 : vector<4x8x1xf32> to vector<4x8x8xf32>
    %35 = arith.mulf %30, %34 : vector<4x8x8xf32>
    %36 = arith.truncf %35 : vector<4x8x8xf32> to vector<4x8x8xbf16>
    "tpu.trace_start"() <{level = 10 : i32, message = "hij,jhd->ihd"}> : () -> ()
    %cst_15 = arith.constant dense<0.000000e+00> : vector<4x8x8xf32>
    %37 = tpu.matmul %21, %36, %cst_15 {dimension_numbers = #tpu.dot_dimension_numbers<[0], [2], [2], [1], [0, 1, 0, 2, 1, 1], [1], [0]>} : vector<8x4x8xbf16>, vector<4x8x8xbf16>, vector<4x8x8xf32> -> vector<4x8x8xf32>
    %38 = tpu.transpose %37, [2, 0, 1] : vector<4x8x8xf32> -> vector<8x4x8xf32>
    "tpu.trace_stop"() : () -> ()
    %39 = vector.shape_cast %38 : vector<8x4x8xf32> to vector<8x32xf32>
    %cst_16 = arith.constant 0.000000e+00 : f32
    %40 = vector.shape_cast %5 : vector<8x1xi1> to vector<8x1xi1>
    %41 = vector.broadcast %40 : vector<8x1xi1> to vector<8x32xi1>
    %42 = vector.broadcast %cst_16 : f32 to vector<8x32xf32>
    %43 = arith.select %41, %42, %39 : vector<8x32xi1>, vector<8x32xf32>
    %44 = arith.truncf %43 : vector<8x32xf32> to vector<8x32xbf16>
    %c0_17 = arith.constant 0 : index
    %c0_18 = arith.constant 0 : index
    %45 = vector.load %arg5[%c0_17, %c0_18] : memref<32x32xbf16, #tpu.memory_space<vmem>>, vector<32x32xbf16>
    %cst_19 = arith.constant dense<0.000000e+00> : vector<8x32xf32>
    %46 = tpu.matmul %44, %45, %cst_19 {dimension_numbers = #tpu.dot_dimension_numbers<[1], [0], [0], [1], [0, 0, 1, 1], [], []>} : vector<8x32xbf16>, vector<32x32xbf16>, vector<8x32xf32> -> vector<8x32xf32>
    %47 = arith.addf %46, %1 : vector<8x32xf32>
    %cst_20 = arith.constant dense<0.000000e+00> : vector<8xf32>
    %48 = vector.multi_reduction <add>, %47, %cst_20 [1] : vector<8x32xf32> to vector<8xf32>
    %49 = vector.shape_cast %48 : vector<8xf32> to vector<8x1xf32>
    %cst_21 = arith.constant 3.200000e+01 : f32
    %50 = vector.broadcast %cst_21 : f32 to vector<8x1xf32>
    %51 = arith.divf %49, %50 : vector<8x1xf32>
    %52 = vector.broadcast %51 : vector<8x1xf32> to vector<8x32xf32>
    %53 = arith.subf %47, %52 : vector<8x32xf32>
    %54 = arith.mulf %53, %53 : vector<8x32xf32>
    %cst_22 = arith.constant dense<0.000000e+00> : vector<8xf32>
    %55 = vector.multi_reduction <add>, %54, %cst_22 [1] : vector<8x32xf32> to vector<8xf32>
    %56 = vector.shape_cast %55 : vector<8xf32> to vector<8x1xf32>
    %cst_23 = arith.constant 3.200000e+01 : f32
    %57 = vector.broadcast %cst_23 : f32 to vector<8x1xf32>
    %58 = arith.divf %56, %57 : vector<8x1xf32>
    %59 = vector.broadcast %51 : vector<8x1xf32> to vector<8x32xf32>
    %60 = arith.subf %47, %59 : vector<8x32xf32>
    %cst_24 = arith.constant 9.99999974E-6 : f32
    %61 = vector.broadcast %cst_24 : f32 to vector<8x1xf32>
    %62 = arith.addf %58, %61 : vector<8x1xf32>
    %63 = math.rsqrt %62 : vector<8x1xf32>
    %64 = vector.broadcast %63 : vector<8x1xf32> to vector<8x32xf32>
    %65 = arith.mulf %60, %64 : vector<8x32xf32>
    %c0_25 = arith.constant 0 : index
    %c0_26 = arith.constant 0 : index
    %66 = vector.load %arg10[%c0_25, %c0_26] : memref<1x32xf32, #tpu.memory_space<vmem>>, vector<1x32xf32>
    %67 = vector.broadcast %66 : vector<1x32xf32> to vector<8x32xf32>
    %68 = arith.mulf %65, %67 : vector<8x32xf32>
    %c0_27 = arith.constant 0 : index
    %c0_28 = arith.constant 0 : index
    %69 = vector.load %arg11[%c0_27, %c0_28] : memref<1x32xf32, #tpu.memory_space<vmem>>, vector<1x32xf32>
    %70 = vector.broadcast %69 : vector<1x32xf32> to vector<8x32xf32>
    %71 = arith.addf %68, %70 : vector<8x32xf32>
    %72 = arith.truncf %71 : vector<8x32xf32> to vector<8x32xbf16>
    %c0_29 = arith.constant 0 : index
    %c0_30 = arith.constant 0 : index
    %73 = vector.load %arg6[%c0_29, %c0_30] : memref<32x64xbf16, #tpu.memory_space<vmem>>, vector<32x64xbf16>
    %cst_31 = arith.constant dense<0.000000e+00> : vector<8x64xf32>
    %74 = tpu.matmul %72, %73, %cst_31 {dimension_numbers = #tpu.dot_dimension_numbers<[1], [0], [0], [1], [0, 0, 1, 1], [], []>} : vector<8x32xbf16>, vector<32x64xbf16>, vector<8x64xf32> -> vector<8x64xf32>
    %c0_32 = arith.constant 0 : index
    %c0_33 = arith.constant 0 : index
    %75 = vector.load %arg7[%c0_32, %c0_33] : memref<1x64xf32, #tpu.memory_space<vmem>>, vector<1x64xf32>
    %76 = vector.broadcast %75 : vector<1x64xf32> to vector<8x64xf32>
    %77 = arith.addf %74, %76 : vector<8x64xf32>
    %cst_34 = arith.constant 0.000000e+00 : f32
    %78 = vector.broadcast %cst_34 : f32 to vector<8x64xf32>
    %79 = arith.maximumf %77, %78 : vector<8x64xf32>
    %80 = arith.truncf %79 : vector<8x64xf32> to vector<8x64xbf16>
    %c0_35 = arith.constant 0 : index
    %c0_36 = arith.constant 0 : index
    %81 = vector.load %arg8[%c0_35, %c0_36] : memref<64x32xbf16, #tpu.memory_space<vmem>>, vector<64x32xbf16>
    %cst_37 = arith.constant dense<0.000000e+00> : vector<8x32xf32>
    %82 = tpu.matmul %80, %81, %cst_37 {dimension_numbers = #tpu.dot_dimension_numbers<[1], [0], [0], [1], [0, 0, 1, 1], [], []>} : vector<8x64xbf16>, vector<64x32xbf16>, vector<8x32xf32> -> vector<8x32xf32>
    %c0_38 = arith.constant 0 : index
    %c0_39 = arith.constant 0 : index
    %83 = vector.load %arg9[%c0_38, %c0_39] : memref<1x32xf32, #tpu.memory_space<vmem>>, vector<1x32xf32>
    %84 = vector.broadcast %83 : vector<1x32xf32> to vector<8x32xf32>
    %85 = arith.addf %82, %84 : vector<8x32xf32>
    %86 = arith.addf %85, %71 : vector<8x32xf32>
    %cst_40 = arith.constant dense<0.000000e+00> : vector<8xf32>
    %87 = vector.multi_reduction <add>, %86, %cst_40 [1] : vector<8x32xf32> to vector<8xf32>
    %88 = vector.shape_cast %87 : vector<8xf32> to vector<8x1xf32>
    %cst_41 = arith.constant 3.200000e+01 : f32
    %89 = vector.broadcast %cst_41 : f32 to vector<8x1xf32>
    %90 = arith.divf %88, %89 : vector<8x1xf32>
    %91 = vector.broadcast %90 : vector<8x1xf32> to vector<8x32xf32>
    %92 = arith.subf %86, %91 : vector<8x32xf32>
    %93 = arith.mulf %92, %92 : vector<8x32xf32>
    %cst_42 = arith.constant dense<0.000000e+00> : vector<8xf32>
    %94 = vector.multi_reduction <add>, %93, %cst_42 [1] : vector<8x32xf32> to vector<8xf32>
    %95 = vector.shape_cast %94 : vector<8xf32> to vector<8x1xf32>
    %cst_43 = arith.constant 3.200000e+01 : f32
    %96 = vector.broadcast %cst_43 : f32 to vector<8x1xf32>
    %97 = arith.divf %95, %96 : vector<8x1xf32>
    %98 = vector.broadcast %90 : vector<8x1xf32> to vector<8x32xf32>
    %99 = arith.subf %86, %98 : vector<8x32xf32>
    %cst_44 = arith.constant 9.99999974E-6 : f32
    %100 = vector.broadcast %cst_44 : f32 to vector<8x1xf32>
    %101 = arith.addf %97, %100 : vector<8x1xf32>
    %102 = math.rsqrt %101 : vector<8x1xf32>
    %103 = vector.broadcast %102 : vector<8x1xf32> to vector<8x32xf32>
    %104 = arith.mulf %99, %103 : vector<8x32xf32>
    %c0_45 = arith.constant 0 : index
    %c0_46 = arith.constant 0 : index
    %105 = vector.load %arg12[%c0_45, %c0_46] : memref<1x32xf32, #tpu.memory_space<vmem>>, vector<1x32xf32>
    %106 = vector.broadcast %105 : vector<1x32xf32> to vector<8x32xf32>
    %107 = arith.mulf %104, %106 : vector<8x32xf32>
    %c0_47 = arith.constant 0 : index
    %c0_48 = arith.constant 0 : index
    %108 = vector.load %arg13[%c0_47, %c0_48] : memref<1x32xf32, #tpu.memory_space<vmem>>, vector<1x32xf32>
    %109 = vector.broadcast %108 : vector<1x32xf32> to vector<8x32xf32>
    %110 = arith.addf %107, %109 : vector<8x32xf32>
    %cst_49 = arith.constant 0.000000e+00 : f32
    %111 = vector.shape_cast %5 : vector<8x1xi1> to vector<8x1xi1>
    %112 = vector.broadcast %111 : vector<8x1xi1> to vector<8x32xi1>
    %113 = vector.broadcast %cst_49 : f32 to vector<8x32xf32>
    %114 = arith.select %112, %113, %110 : vector<8x32xi1>, vector<8x32xf32>
    %c0_50 = arith.constant 0 : index
    %c0_51 = arith.constant 0 : index
    %c0_52 = arith.constant 0 : index
    %115 = vector.load %arg14[%c0_50, %c0_51, %c0_52] : memref<1x8x32xf32, #tpu.memory_space<vmem>>, vector<1x8x32xf32>
    %116 = vector.shape_cast %115 : vector<1x8x32xf32> to vector<8x32xf32>
    %117 = vector.shape_cast %114 : vector<8x32xf32> to vector<1x8x32xf32>
    tpu.vector_store %arg14[%c0_50, %c0_51, %c0_52], %117 {strides = array<i32>} : memref<1x8x32xf32, #tpu.memory_space<vmem>>, vector<1x8x32xf32>,
    return
  }
  func.func @transform_0(%arg0: i32) -> (i32, i32, i32) {
    %c0_i32 = arith.constant 0 : i32
    %c0_i32_0 = arith.constant 0 : i32
    %c0_i32_1 = arith.constant 0 : i32
    return %arg0, %c0_i32, %c0_i32_0 : i32, i32, i32
  }
  func.func @transform_1(%arg0: i32) -> (i32, i32, i32) {
    %c0_i32 = arith.constant 0 : i32
    %c0_i32_0 = arith.constant 0 : i32
    %c0_i32_1 = arith.constant 0 : i32
    return %arg0, %c0_i32, %c0_i32_0 : i32, i32, i32
  }
  func.func @transform_2(%arg0: i32) -> (i32, i32, i32) {
    %c0_i32 = arith.constant 0 : i32
    %c0_i32_0 = arith.constant 0 : i32
    %c0_i32_1 = arith.constant 0 : i32
    return %arg0, %c0_i32, %c0_i32_0 : i32, i32, i32
  }
  func.func @transform_3(%arg0: i32) -> (i32, i32) {
    %c0_i32 = arith.constant 0 : i32
    %c0_i32_0 = arith.constant 0 : i32
    %c0_i32_1 = arith.constant 0 : i32
    return %c0_i32, %c0_i32_0 : i32, i32
  }
  func.func @transform_4(%arg0: i32) -> (i32, i32) {
    %c0_i32 = arith.constant 0 : i32
    %c0_i32_0 = arith.constant 0 : i32
    %c0_i32_1 = arith.constant 0 : i32
    return %c0_i32, %c0_i32_0 : i32, i32
  }
  func.func @transform_5(%arg0: i32) -> (i32, i32) {
    %c0_i32 = arith.constant 0 : i32
    %c0_i32_0 = arith.constant 0 : i32
    %c0_i32_1 = arith.constant 0 : i32
    return %c0_i32, %c0_i32_0 : i32, i32
  }
  func.func @transform_6(%arg0: i32) -> (i32, i32) {
    %c0_i32 = arith.constant 0 : i32
    %c0_i32_0 = arith.constant 0 : i32
    %c0_i32_1 = arith.constant 0 : i32
    return %c0_i32, %c0_i32_0 : i32, i32
  }
  func.func @transform_7(%arg0: i32) -> (i32, i32) {
    %c0_i32 = arith.constant 0 : i32
    %c0_i32_0 = arith.constant 0 : i32
    %c0_i32_1 = arith.constant 0 : i32
    return %c0_i32, %c0_i32_0 : i32, i32
  }
  func.func @transform_8(%arg0: i32) -> (i32, i32) {
    %c0_i32 = arith.constant 0 : i32
    %c0_i32_0 = arith.constant 0 : i32
    %c0_i32_1 = arith.constant 0 : i32
    return %c0_i32, %c0_i32_0 : i32, i32
  }
  func.func @transform_9(%arg0: i32) -> (i32, i32) {
    %c0_i32 = arith.constant 0 : i32
    %c0_i32_0 = arith.constant 0 : i32
    %c0_i32_1 = arith.constant 0 : i32
    return %c0_i32, %c0_i32_0 : i32, i32
  }
  func.func @transform_10(%arg0: i32) -> (i32, i32) {
    %c0_i32 = arith.constant 0 : i32
    %c0_i32_0 = arith.constant 0 : i32
    %c0_i32_1 = arith.constant 0 : i32
    return %c0_i32, %c0_i32_0 : i32, i32
  }
  func.func @transform_11(%arg0: i32) -> (i32, i32) {
    %c0_i32 = arith.constant 0 : i32
    %c0_i32_0 = arith.constant 0 : i32
    %c0_i32_1 = arith.constant 0 : i32
    return %c0_i32, %c0_i32_0 : i32, i32
  }
  func.func @transform_12(%arg0: i32) -> (i32, i32) {
    %c0_i32 = arith.constant 0 : i32
    %c0_i32_0 = arith.constant 0 : i32
    %c0_i32_1 = arith.constant 0 : i32
    return %c0_i32, %c0_i32_0 : i32, i32
  }
  func.func @transform_13(%arg0: i32) -> (i32, i32, i32) {
    %c0_i32 = arith.constant 0 : i32
    %c0_i32_0 = arith.constant 0 : i32
    %c0_i32_1 = arith.constant 0 : i32
    return %arg0, %c0_i32, %c0_i32_0 : i32, i32, i32
  }
}

</mosaic_0001>

<bundles_post_ra>
// kernel: tpu_custom_call.1
= control target key start
LH: loop header
LB: loop body
LE: loop exit
PB: predicated region body
PF: predicated region fallthrough
CT: control target
= control target key end

     0   :  { %s3569_s0 = inlined_call_operand.vmem [shape: f32[2,8,32], index: 0, kind: input, shape index: {}]   ;;  %s3570_s1 = inlined_call_operand.vmem [shape: f32[2,8,1], index: 1, kind: input, shape index: {}]   ;;  %s3571_s2 = inlined_call_operand.vmem [shape: f32[2,1,8], index: 2, kind: input, shape index: {}]   ;;  %s3572_s3 = inlined_call_operand.vmem [shape: bf16[32,96], index: 3, kind: input, shape index: {}]   ;;  %s3573_s4 = inlined_call_operand.vmem [shape: bf16[32,32], index: 4, kind: input, shape index: {}]   ;;  %s3574_s5 = inlined_call_operand.vmem [shape: bf16[32,64], index: 5, kind: input, shape index: {}]   ;;  %s3575_s6 = inlined_call_operand.vmem [shape: f32[1,64], index: 6, kind: input, shape index: {}]   ;;  %s3576_s7 = inlined_call_operand.vmem [shape: bf16[64,32], index: 7, kind: input, shape index: {}]   ;;  %s3577_s8 = inlined_call_operand.vmem [shape: f32[1,32], index: 8, kind: input, shape index: {}]   ;;  %s3578_s9 = inlined_call_operand.vmem [shape: f32[1,32], index: 9, kind: input, shape index: {}]   ;;  %s3579_s10 = inlined_call_operand.vmem [shape: f32[1,32], index: 10, kind: input, shape index: {}]   ;;  %s3580_s11 = inlined_call_operand.vmem [shape: f32[1,32], index: 11, kind: input, shape index: {}]   ;;  %s3581_s12 = inlined_call_operand.vmem [shape: f32[1,32], index: 12, kind: input, shape index: {}]   ;;  %s3582_s13 = inlined_call_operand.hbm [shape: f32[2,8,32], index: 13, kind: output, shape index: {}]  }
   0x1   :  { %3583 = sst [smem:[#allocation5_spill]] %s3569_s0 }
   0x2   :  { %3584 = sst [smem:[#allocation6_spill]] %s3570_s1 }
   0x3   :  { %3585 = sst [smem:[#allocation7_spill]] %s3571_s2 }
   0x4   :  { %3586 = sst [smem:[#allocation8_spill]] %s3572_s3 }
   0x5   :  { %18 = vsyncpa [#allocation3], 0 }
   0x6   :  { %20 = vsyncpa [#allocation3 + $0x1], 0  ;;  %s3163_s25 = smov 0   ;;  %s3165_s26 = smov 0  }
   0x7   :  { %s3167_s27 = smov 0   ;;  %s3169_s28 = smov 0  }
   0x8 LB: > { %s3184_s29 = sadd.s32 4294967295, %s3077_s28   ;;  %s2773_s30 = sadd.s32 4294967294, %s3077_s28   ;;  %s3077_s28 = sphi %s3169_s28, %s3596_s28   ;;  %s3073_s27 = sphi %s3167_s27, %s3595_s27   ;;  %s3069_s26 = sphi %s3165_s26, %s3594_s26   ;;  %s3065_s25 = sphi %s3163_s25, %s3593_s25  }
   0x9   : > { %s3188_s14 = sadd.s32 1, %s3077_s28   ;;  %s321_s15 = sadd.s32 1, %s3073_s27 }
   0xa   : > { %s318_s16 = ssub.s32 %s3077_s28, %s3188_s14  ;;  %p331_p0 = scmp.ne.s32.totalorder %s3073_s27, %s3069_s26 }
   0xb   : > { %p319_p1 = scmp.eq.s32.totalorder %s318_s16, 0  ;;  %p332_p2 = scmp.eq.s32.totalorder %s3184_s29, 1 }
   0xc   : > { %p337_p3 = scmp.ne.s32.totalorder %s3069_s26, %s3065_s25  ;;  %p338_p4 = scmp.eq.s32.totalorder %s2773_s30, 1 }
   0xd   : > { %s3199_s17 = scalar_select %p319_p1, %s3073_s27, %s321_s15  }
   0xe   : > { %p3201_p5 = por %p332_p2, %p331_p0  ;;  %p3205_p6 = por %p338_p4, %p337_p3 }
   0xf   : > { %p2776_p7 = scmp.ge.s32.totalorder %s3077_s28, 1  ;;  %p406_p8 = scmp.lt.s32.totalorder %s3077_s28, 3 }
  0x11   : > { %p407_p9 = pnand %p2776_p7, %p406_p8 }
  0x12   : > { %s3589_s3 = sld [smem:[#allocation8_spill]] (!%p407_p9)  ;;  %p456_p10 = scmp.lt.s32.totalorder (!%p407_p9), %s3184_s29, 1 }
  0x13   : > { %410 = sbr.rel (%p407_p9) target bundleno = 3076 (0xc04), region = 72  ;;  %s3590_s0 = sld [smem:[#allocation5_spill]] (!%p407_p9) }
  0x14   : > { %s3081_s21 = smov (!%p407_p9), 104   ;;  %s3082_s22 = smov (!%p407_p9), 120  }
  0x15   : > { %s3083_s23 = smov (!%p407_p9), 96   ;;  %s3084_s15 = smov (!%p407_p9), 112  }
  0x16   : > { %s3088_s16 = smov (!%p407_p9), 64   ;;  %s3591_s2 = sld [smem:[#allocation7_spill]] (!%p407_p9) }
  0x17   : > { %s3592_s1 = sld [smem:[#allocation6_spill]] (!%p407_p9) }
  0x18   : > { %v2986_v0 = vld [vmem:[%s3589_s3 + $0x8] sm:$0xff]   ;;  %v3079_v1 = vmov 0.0   ;;  %v2987_v2 = vld [vmem:[%s3589_s3] sm:$0xff]   ;;  %vm3080_vm0 = vmmov 0   ;;  %s3226_s24 = scalar_select %p456_p10, %s3184_s29, 1  ;;  %vm490_vm1 = vcmask 261120   ;;  %v549_v14 = vlaneseq }
  0x19   : > { %2848 = vmatprep.subr.bf16.mxu0 %v3079_v1  ;;  %2856 = vmatprep.subr.bf16.mxu1 %v3079_v1  ;;  %v3085_v12 = vmov 1983009808   ;;  %v3086_v18 = vmov 1934713408   ;;  %vm1286_vm2 = vcmask 1043456   ;;  %vm1282_vm3 = vcmask 64512  }
  0x1a   : > { %2849 = vmatpush3.bf16.msra.mxu0 %v2986_v0  ;;  %2852 = vmatprep.mubr.msk.bf16.mxu0 %vm3080_vm0, %v3079_v1  ;;  %s2778_s30 = sshll.u32 %s3226_s24, 3  ;;  %v547_v13 = vunpack.c.l.s4 %v3085_v12  ;;  %v3256_v16 = vshrl.u32 %v549_v14, 7  ;;  %v579_v19 = vunpack.c.l.s4 %v3086_v18  ;;  %vm2395_vm5 = vcmask 130048  }
  0x1b   : > { %2850 = vmatprep.subr.bf16.mxu0 %v3079_v1  ;;  %2858 = vmatprep.mubr.msk.bf16.mxu1 %vm3080_vm0, %v3079_v1  ;;  %s3234_s20 = scalar_lea.vmem %s3590_s0, %s2778_s30  ;;  %vm2397_vm6 = vcmask 195584   ;;  %vm2603_vm8 = vcmask 523264  }
  0x1c   : > { %v468_v3 = vld [vmem:[%s3234_s20] sm:$0xff]  ;;  %v548_v15 = vunpack.c.0.s8 %v547_v13  ;;  %v580_v22 = vunpack.c.0.s8 %v579_v19 }
  0x1d   : > { %v473_v4 = vpack.c.bf16 %v468_v3, %v468_v3 }
  0x1e   : > { %2851 = vmatpush3.bf16.msra.mxu0 %v2987_v2  ;;  %v3259_v21 = vsub.s32 %v548_v15, %v3256_v16  ;;  %v3266_v33 = vsub.s32 %v580_v22, %v3256_v16 }
  0x1f   : > { %2880 = vmatprep.subr.bf16.mxu0 %v3079_v1 }
  0x21   : > { %2853 = vmatmul.mubr.msk.bf16.vlgmr.msra.gmra.mxu0 %vm490_vm1, %v473_v4 }
  0x22   : > { %2882 = vmatprep.mubr.msk.bf16.mxu0 %vm3080_vm0, %v3079_v1 }
  0xe1   : > { %v3241_v5 = vpop.f32.mrf.mxu0 }
  0xe2   : > { %541 = vrot.lane.b32.xlu1 %v3241_v5, %s3081_s21  ;;  %535 = vrot.lane.b32.xlu0 %v3241_v5, %s3082_s22  ;;  %s463_s21 = scalar_lea.vmem %s3592_s1, %s2778_s30 }
  0xe3   : > { %v2854_v6 = vpop.f32.mrf.mxu0 }
  0xe5   : > { %v531_v7 = vpop.f32.mrf.mxu0 }
  0xe6   : > { %620 = vrot.lane.b32.xlu1 %v3241_v5, %s3083_s23  ;;  %538 = vrot.lane.b32.xlu0 %v3241_v5, %s3084_s15  ;;  %s3089_s15 = smov 16  }
  0xe7   : > { %v2855_v8 = vpop.f32.mrf.mxu0 }
 0x154   : > { %v3247_v9 = vpop.permute.xlu0 %535  ;;  %v3250_v10 = vpop.permute.xlu1 %541 }
 0x155   : > { %622 = vrot.lane.b32.xlu0 %v3247_v9, %s3083_s23 }
 0x158   : > { %v3252_v11 = vpop.permute.xlu0 %538  ;;  %v621_v17 = vpop.permute.xlu1 %620 }
 0x159   : > { %626 = vrot.lane.b32.xlu0 %v3250_v10, %s3083_s23  ;;  %624 = vrot.lane.b32.xlu1 %v3252_v11, %s3083_s23  ;;  %s466_s23 = scalar_lea.vmem %s3591_s2, %s3226_s24 }
 0x1c7   : > { %v623_v20 = vpop.permute.xlu0 %622 }
 0x1cb   : > { %v625_v23 = vpop.permute.xlu1 %624  ;;  %v627_v24 = vpop.permute.xlu0 %626 }
 0x1cc   : > { %v632_v25 = vcombine.low %v621_v17, %v625_v23  ;;  %v633_v26 = vcombine.high %v621_v17, %v625_v23  ;;  %v648_v27 = vcombine.low %v623_v20, %v627_v24  ;;  %v649_v28 = vcombine.high %v623_v20, %v627_v24 }
 0x1ce   : > { %v640_v29 = vrot.slane %v632_v25, %v3259_v21  ;;  %v647_v30 = vrot.slane %v633_v26, %v3259_v21  ;;  %v656_v31 = vrot.slane %v648_v27, %v3259_v21  ;;  %v663_v32 = vrot.slane %v649_v28, %v3259_v21 }
 0x1cf   : > { %v3087_v27 = vmov 0  }
 0x1d0   : > { %v665_v34 = vcombine.high %v640_v29, %v656_v31  ;;  %v664_v35 = vcombine.low %v640_v29, %v656_v31  ;;  %v680_v36 = vcombine.low %v647_v30, %v663_v32  ;;  %v681_v39 = vcombine.high %v647_v30, %v663_v32 }
 0x1d2   : > { %v679_v37 = vrot.slane %v665_v34, %v3266_v33  ;;  %v672_v38 = vrot.slane %v664_v35, %v3266_v33  ;;  %v688_v42 = vrot.slane %v680_v36, %v3266_v33  ;;  %v695_v44 = vrot.slane %v681_v39, %v3266_v33 }
 0x1d4   : > { %v702_v40 = vpack.c.bf16 %v679_v37, %v679_v37  ;;  %v700_v41 = vpack.c.bf16 %v672_v38, %v672_v38  ;;  %v697_v43 = vcombine.high %v679_v37, %v3079_v1  ;;  %v704_v45 = vpack.c.bf16 %v688_v42, %v688_v42 }
 0x1d5   : > { %v698_v47 = vcombine.high %v688_v42, %v3079_v1  ;;  %v696_v48 = vcombine.high %v672_v38, %v3079_v1  ;;  %v699_v51 = vcombine.high %v695_v44, %v3079_v1  ;;  %v706_v53 = vpack.c.bf16 %v695_v44, %v695_v44 }
 0x1d6   : > { %896 = vxpose.xlu0.c.b16.start.end [1/1] (short) (narrow) %v702_v40, 16  ;;  %864 = vxpose.xlu1.c.b16.start.end [1/1] (short) (narrow) %v700_v41, 16  ;;  %v703_v46 = vpack.c.bf16 %v697_v43, %v697_v43  ;;  %v544_v43 = vcombine.low %v3241_v5, %v3252_v11  ;;  %v545_v44 = vcombine.high %v3241_v5, %v3252_v11 }
 0x1d7   : > { %v705_v49 = vpack.c.bf16 %v698_v47, %v698_v47  ;;  %v701_v50 = vpack.c.bf16 %v696_v48, %v696_v48  ;;  %v707_v52 = vpack.c.bf16 %v699_v51, %v699_v51 }
 0x1d8   : > { %v552_v47 = vrot.slane %v544_v43, %v3259_v21  ;;  %v559_v48 = vrot.slane %v545_v44, %v3259_v21 }
 0x1da   : > { %928 = vxpose.xlu0.c.b16.start.end [1/1] (short) (narrow) %v704_v45, 16  ;;  %912 = vxpose.xlu1.c.b16.start.end [1/1] (short) (narrow) %v703_v46, 16  ;;  %v560_v45 = vcombine.low %v3247_v9, %v3250_v10  ;;  %v561_v46 = vcombine.high %v3247_v9, %v3250_v10 }
 0x1de   : > { %944 = vxpose.xlu1.c.b16.start.end [1/1] (short) (narrow) %v705_v49, 16  ;;  %880 = vxpose.xlu0.c.b16.start.end [1/1] (short) (narrow) %v701_v50, 16  ;;  %v568_v49 = vrot.slane %v560_v45, %v3259_v21  ;;  %v575_v50 = vrot.slane %v561_v46, %v3259_v21 }
 0x1e0   : > { %v576_v51 = vcombine.low %v552_v47, %v568_v49 }
 0x1e2   : > { %976 = vxpose.xlu1.c.b16.start.end [1/1] (short) (narrow) %v707_v52, 16  ;;  %960 = vxpose.xlu0.c.b16.start.end [1/1] (short) (narrow) %v706_v53, 16  ;;  %v592_v52 = vcombine.low %v559_v48, %v575_v50  ;;  %v577_v53 = vcombine.high %v552_v47, %v568_v49 }
 0x238   : > { %v904_v54 = vpop.trf.xlu0  ;;  %v872_v55 = vpop.trf.xlu1 }
 0x23c   : > { %v936_v56 = vpop.trf.xlu0  ;;  %v920_v57 = vpop.trf.xlu1 }
 0x23d   : > { %v992_v60 = vcombine.low %v872_v55, %v936_v56  ;;  %v600_v56 = vrot.slane %v592_v52, %v3266_v33 }
 0x23f   : > { %v999_v3 = vrot.slane %v992_v60, %v3259_v21 }
 0x240   : > { %v952_v58 = vpop.trf.xlu1  ;;  %v888_v59 = vpop.trf.xlu0 }
 0x241   : > { %v1026_v61 = vcombine.low %v888_v59, %v952_v58 }
 0x243   : > { %v1033_v4 = vrot.slane %v1026_v61, %v3259_v21  ;;  %v610_v61 = vcombine.high %v600_v56, %v3079_v1 }
 0x244   : > { %v984_v62 = vpop.trf.xlu1  ;;  %v968_v63 = vpop.trf.xlu0 }
 0x245   : > { %v1034_v0 = vcombine.low %v920_v57, %v984_v62  ;;  %v1000_v2 = vcombine.low %v904_v54, %v968_v63  ;;  %v593_v54 = vcombine.high %v559_v48, %v575_v50 }
 0x247   : > { %v1041_v6 = vrot.slane %v1034_v0, %v3259_v21  ;;  %v1007_v7 = vrot.slane %v1000_v2, %v3259_v21  ;;  %v607_v58 = vrot.slane %v593_v54, %v3266_v33 }
 0x249   : > { %v1042_v8 = vcombine.low %v1033_v4, %v1041_v6  ;;  %v1043_v12 = vcombine.high %v1033_v4, %v1041_v6  ;;  %v1008_v13 = vcombine.low %v999_v3, %v1007_v7  ;;  %v1009_v14 = vcombine.high %v999_v3, %v1007_v7 }
 0x24a   : > { %v611_v0 = vcombine.high %v607_v58, %v3079_v1 }
 0x24b   : > { %v1016_v15 = vrot.slane %v1008_v13, %v3266_v33  ;;  %v1050_v17 = vrot.slane %v1042_v8, %v3266_v33  ;;  %v1023_v18 = vrot.slane %v1009_v14, %v3266_v33  ;;  %v1057_v19 = vrot.slane %v1043_v12, %v3266_v33 }
 0x24d   : > { %v1062_v20 = vpack.i.b16 %v1050_v17, %v1016_v15  ;;  %v1064_v22 = vshrl.u32 %v1016_v15, 16  ;;  %v1065_v23 = vshrl.u32 %v1050_v17, 16  ;;  %v1080_v24 = vshrl.u32 %v1023_v18, 16 }
 0x24e   : > { %v1081_v26 = vshrl.u32 %v1057_v19, 16  ;;  %v1024_v28 = vcombine.high %v1016_v15, %v3087_v27  ;;  %v1058_v29 = vcombine.high %v1050_v17, %v3087_v27  ;;  %v1078_v30 = vpack.i.b16 %v1057_v19, %v1023_v18 }
 0x24f   : > { %1092 = vxpose.xlu0.c.b16.start.end [1/1] (short) (narrow) %v1062_v20, 16  ;;  %v1066_v25 = vpack.i.b16 %v1065_v23, %v1064_v22  ;;  %v1025_v31 = vcombine.high %v1023_v18, %v3087_v27  ;;  %v1059_v36 = vcombine.high %v1057_v19, %v3087_v27 }
 0x250   : > { %v1082_v32 = vpack.i.b16 %v1081_v26, %v1080_v24  ;;  %v1072_v34 = vshrl.u32 %v1024_v28, 16  ;;  %v1073_v35 = vshrl.u32 %v1058_v29, 16  ;;  %v1070_v37 = vpack.i.b16 %v1058_v29, %v1024_v28 }
 0x251   : > { %1108 = vxpose.xlu1.c.b16.start.end [1/1] (short) (narrow) %v1066_v25, 16  ;;  %v1088_v39 = vshrl.u32 %v1025_v31, 16  ;;  %v1089_v40 = vshrl.u32 %v1059_v36, 16  ;;  %v1086_v41 = vpack.i.b16 %v1059_v36, %v1025_v31 }
 0x252   : > { %v1074_v38 = vpack.i.b16 %v1073_v35, %v1072_v34 }
 0x253   : > { %1156 = vxpose.xlu0.c.b16.start.end [1/1] (short) (narrow) %v1078_v30, 16  ;;  %v1090_v42 = vpack.i.b16 %v1089_v40, %v1088_v39 }
 0x255   : > { %1172 = vxpose.xlu1.c.b16.start.end [1/1] (short) (narrow) %v1082_v32, 16 }
 0x257   : > { %1124 = vxpose.xlu0.c.b16.start.end [1/1] (short) (narrow) %v1070_v37, 16 }
 0x259   : > { %1140 = vxpose.xlu1.c.b16.start.end [1/1] (short) (narrow) %v1074_v38, 16 }
 0x25b   : > { %1188 = vxpose.xlu0.c.b16.start.end [1/1] (short) (narrow) %v1086_v41, 16 }
 0x25d   : > { %1204 = vxpose.xlu1.c.b16.start.end [1/1] (short) (narrow) %v1090_v42, 16 }
 0x261   : > { %710 = vrot.lane.b32.xlu1 %v3247_v9, %s3088_s16  ;;  %v591_v9 = vrot.slane %v577_v53, %v3266_v33 }
 0x263   : > { %v609_v63 = vcombine.high %v591_v9, %v3079_v1  ;;  %v2784_v13 = vpack.c.bf16 %v607_v58, %v591_v9 }
 0x264   : > { %708 = vrot.lane.b32.xlu0 %v3241_v5, %s3088_s16  ;;  %v584_v5 = vrot.slane %v576_v51, %v3266_v33 }
 0x265   : > { %v2786_v6 = vpack.c.bf16 %v611_v0, %v609_v63  ;;  %v817_v25 = vrot.slane %v2784_v13, %v3259_v21 }
 0x266   : > { %v608_v60 = vcombine.high %v584_v5, %v3079_v1  ;;  %v2783_v8 = vpack.c.bf16 %v600_v56, %v584_v5 }
 0x267   : > { %v842_v23 = vrot.slane %v2786_v6, %v3259_v21 }
 0x268   : > { %v2785_v3 = vpack.c.bf16 %v610_v61, %v608_v60  ;;  %v809_v24 = vrot.slane %v2783_v8, %v3259_v21  ;;  %v471_v60 = vld [vmem:[%s466_s23] sm:$0x1]  ;;  %s453_s23 = sand.u32 1, %s3069_s26  }
 0x269   : > { %v472_v61 = vmul.f32 -1e+30, %v471_v60 }
 0x26a   : > { %v834_v18 = vrot.slane %v2785_v3, %v3259_v21  ;;  %v818_v35 = vcombine.low %v809_v24, %v817_v25 }
 0x26c   : > { %v843_v32 = vcombine.low %v834_v18, %v842_v23  ;;  %v825_v41 = vrot.slane %v818_v35, %v3266_v33 }
 0x26e   : > { %v850_v37 = vrot.slane %v843_v32, %v3266_v33  ;;  %v855_v48 = vshrl.u32 %v825_v41, 16 }
 0x270   : > { %v854_v43 = vpack.i.b16 %v850_v37, %v825_v41  ;;  %v856_v46 = vshrl.u32 %v850_v37, 16  ;;  %v851_v53 = vcombine.high %v850_v37, %v3087_v27 }
 0x272   : > { %v857_v50 = vpack.i.b16 %v856_v46, %v855_v48  ;;  %v862_v9 = vshrl.u32 %v851_v53, 16 }
 0x2b1   : > { %v1100_v55 = vpop.trf.xlu0 }
 0x2b3   : > { %v1116_v57 = vpop.trf.xlu1 }
 0x2b5   : > { %v1164_v59 = vpop.trf.xlu0 }
 0x2b6   : > { %v1220_v7 = vcombine.low %v1100_v55, %v1164_v59  ;;  %v826_v55 = vcombine.high %v825_v41, %v3087_v27 }
 0x2b7   : > { %v1180_v62 = vpop.trf.xlu1 }
 0x2b8   : > { %v1245_v14 = vcombine.low %v1116_v57, %v1180_v62  ;;  %v1227_v19 = vrot.slane %v1220_v7, %v3259_v21  ;;  %v860_v56 = vpack.i.b16 %v851_v53, %v826_v55  ;;  %v861_v58 = vshrl.u32 %v826_v55, 16 }
 0x2b9   : > { %v1132_v2 = vpop.trf.xlu0  ;;  %v799_v62 = vsub.s32 0, %v3256_v16 }
 0x2ba   : > { %v1252_v26 = vrot.slane %v1245_v14, %v3259_v21  ;;  %v863_v59 = vpack.i.b16 %v862_v9, %v861_v58 }
 0x2bb   : > { %v1148_v4 = vpop.trf.xlu1  ;;  %v800_v63 = vrot.slane %v472_v61, %v799_v62 }
 0x2bd   : > { %v1196_v12 = vpop.trf.xlu0 }
 0x2be   : > { %v1228_v15 = vcombine.low %v1132_v2, %v1196_v12 }
 0x2bf   : > { %v1212_v17 = vpop.trf.xlu1 }
 0x2c0   : > { %v1235_v20 = vrot.slane %v1228_v15, %v3259_v21  ;;  %v1253_v22 = vcombine.low %v1148_v4, %v1212_v17 }
 0x2c2   : > { %v1236_v28 = vcombine.low %v1227_v19, %v1235_v20  ;;  %v1260_v29 = vrot.slane %v1253_v22, %v3259_v21 }
 0x2c4   : > { %v1243_v30 = vrot.slane %v1236_v28, %v3266_v33  ;;  %v1261_v31 = vcombine.low %v1252_v26, %v1260_v29 }
 0x2c6   : > { %v1268_v34 = vrot.slane %v1261_v31, %v3266_v33  ;;  %v1273_v38 = vshrl.u32 %v1243_v30, 16  ;;  %v1244_v47 = vcombine.high %v1243_v30, %v3087_v27 }
 0x2c8   : > { %v1272_v36 = vpack.i.b16 %v1268_v34, %v1243_v30  ;;  %v1274_v39 = vshrl.u32 %v1268_v34, 16  ;;  %v1269_v45 = vcombine.high %v1268_v34, %v3087_v27  ;;  %v1279_v54 = vshrl.u32 %v1244_v47, 16 }
 0x2ca   : > { %v1288_v40 = vsel %vm1286_vm2, %v1272_v36, 0  ;;  %v1275_v42 = vpack.i.b16 %v1274_v39, %v1273_v38  ;;  %v1278_v49 = vpack.i.b16 %v1269_v45, %v1244_v47  ;;  %v1280_v52 = vshrl.u32 %v1269_v45, 16 }
 0x2cb   : > { %2857 = vmatpush3.bf16.msra.mxu1 %v1288_v40 }
 0x2cc   : > { %2862 = vmatprep.subr.bf16.mxu1 %v3079_v1  ;;  %v1334_v44 = vsel %vm1286_vm2, %v1275_v42, 0  ;;  %v1380_v51 = vsel %vm1286_vm2, %v1278_v49, 0  ;;  %v1281_v5 = vpack.i.b16 %v1280_v52, %v1279_v54 }
 0x2ce   : > { %2859 = vmatmul.mubr.msk.bf16.vlgmr.msra.gmra.mxu1 %vm1282_vm3, %v854_v43  ;;  %v1426_v57 = vsel %vm1286_vm2, %v1281_v5, 0 }
 0x2cf   : > { %2863 = vmatpush3.bf16.msra.mxu1 %v1334_v44  ;;  %2864 = vmatprep.mubr.msk.bf16.mxu1 %vm3080_vm0, %v3079_v1 }
 0x2d0   : > { %2868 = vmatprep.subr.bf16.mxu1 %v3079_v1 }
 0x2d3   : > { %v711_v32 = vpop.permute.xlu1 %710 }
 0x2d6   : > { %2865 = vmatmul.mubr.msk.bf16.vlgmr.msra.gmra.mxu1 %vm1282_vm3, %v857_v50  ;;  %v709_v31 = vpop.permute.xlu0 %708 }
 0x2d7   : > { %2869 = vmatpush3.bf16.msra.mxu1 %v1380_v51  ;;  %2870 = vmatprep.mubr.msk.bf16.mxu1 %vm3080_vm0, %v3079_v1 }
 0x2d8   : > { %2874 = vmatprep.subr.bf16.mxu1 %v3079_v1 }
 0x2de   : > { %2871 = vmatmul.mubr.msk.bf16.vlgmr.msra.gmra.mxu1 %vm1282_vm3, %v860_v56 }
 0x2df   : > { %2875 = vmatpush3.bf16.msra.mxu1 %v1426_v57  ;;  %2876 = vmatprep.mubr.msk.bf16.mxu1 %vm3080_vm0, %v3079_v1 }
 0x2e0   : > { %2886 = vmatprep.subr.bf16.mxu1 %v3079_v1 }
 0x2e6   : > { %2877 = vmatmul.mubr.msk.bf16.vlgmr.msra.gmra.mxu1 %vm1282_vm3, %v863_v59 }
 0x2e7   : > { %2888 = vmatprep.mubr.msk.bf16.mxu1 %vm3080_vm0, %v3079_v1 }
 0x38e   : > { %v1324_v0 = vpop.f32.mrf.mxu1 }
 0x38f   : > { %v3353_v2 = vadd.f32 %v1324_v0, %v800_v63 }
 0x390   : > { %v2860_v3 = vpop.f32.mrf.mxu1 }
 0x391   : > { %v1468_v4 = vsel %vm1282_vm3, %v3353_v2, -inf }
 0x392   : > { %1469 = vmax.xlane.f32.xlu0 %v1468_v4  ;;  %v1327_v6 = vpop.f32.mrf.mxu1 }
 0x394   : > { %v2861_v7 = vpop.f32.mrf.mxu1 }
 0x396   : > { %v1370_v8 = vpop.f32.mrf.mxu1 }
 0x397   : > { %v3357_v12 = vadd.f32 %v1370_v8, %v800_v63 }
 0x398   : > { %v2866_v13 = vpop.f32.mrf.mxu1 }
 0x399   : > { %v1471_v14 = vsel %vm1282_vm3, %v3357_v12, -inf }
 0x39a   : > { %1472 = vmax.xlane.f32.xlu1 %v1471_v14  ;;  %v1373_v16 = vpop.f32.mrf.mxu1 }
 0x39c   : > { %v2867_v15 = vpop.f32.mrf.mxu1 }
 0x39e   : > { %v1416_v17 = vpop.f32.mrf.mxu1 }
 0x39f   : > { %v3365_v26 = vadd.f32 %v1416_v17, %v800_v63 }
 0x3a0   : > { %v2872_v18 = vpop.f32.mrf.mxu1 }
 0x3a1   : > { %v1474_v28 = vsel %vm1282_vm3, %v3365_v26, -inf }
 0x3a2   : > { %v1419_v19 = vpop.f32.mrf.mxu1 }
 0x3a4   : > { %v2873_v20 = vpop.f32.mrf.mxu1 }
 0x3a6   : > { %v1462_v22 = vpop.f32.mrf.mxu1 }
 0x3a7   : > { %v3369_v29 = vadd.f32 %v1462_v22, %v800_v63 }
 0x3a8   : > { %714 = vrot.lane.b32.xlu0 %v3250_v10, %s3088_s16  ;;  %v2878_v23 = vpop.f32.mrf.mxu1 }
 0x3a9   : > { %v1477_v30 = vsel %vm1282_vm3, %v3369_v29, -inf }
 0x3aa   : > { %v1465_v24 = vpop.f32.mrf.mxu1 }
 0x3ab   : > { %712 = vrot.lane.b32.xlu1 %v3252_v11, %s3088_s16  ;;  %s3090_s16 = smov 8  }
 0x3ac   : > { %v2879_v25 = vpop.f32.mrf.mxu1 }
 0x3c7   : > { %1475 = vmax.xlane.f32.xlu0 %v1474_v28 }
 0x3cf   : > { %1478 = vmax.xlane.f32.xlu1 %v1477_v30 }
 0x41b   : > { %v3373_v10 = vpop.xlane.xlu0 %1469 }
 0x41c   : > { %v1480_v30 = vsub.f32 %v3353_v2, %v3373_v10 }
 0x41f   : > { %v715_v34 = vpop.permute.xlu0 %714 }
 0x420   : > { %v736_v11 = vcombine.low %v711_v32, %v715_v34  ;;  %v737_v36 = vcombine.high %v711_v32, %v715_v34 }
 0x422   : > { %v744_v40 = vrot.slane %v736_v11, %v3259_v21  ;;  %v751_v41 = vrot.slane %v737_v36, %v3259_v21 }
 0x423   : > { %v3375_v35 = vpop.xlane.xlu1 %1472 }
 0x424   : > { %v1481_v34 = vsub.f32 %v3357_v12, %v3375_v35 }
 0x427   : > { %v713_v37 = vpop.permute.xlu1 %712 }
 0x428   : > { %v720_v38 = vcombine.low %v709_v31, %v713_v37  ;;  %v721_v39 = vcombine.high %v709_v31, %v713_v37 }
 0x42a   : > { %v728_v42 = vrot.slane %v720_v38, %v3259_v21  ;;  %v735_v43 = vrot.slane %v721_v39, %v3259_v21 }
 0x42c   : > { %v752_v44 = vcombine.low %v728_v42, %v744_v40  ;;  %v753_v45 = vcombine.high %v728_v42, %v744_v40  ;;  %v768_v46 = vcombine.low %v735_v43, %v751_v41  ;;  %v769_v49 = vcombine.high %v735_v43, %v751_v41 }
 0x42d   : > { %v1484_v41 = vmul.f32 1.442695, %v1480_v30 }
 0x42e   : > { %v760_v47 = vrot.slane %v752_v44, %v3266_v33  ;;  %v767_v48 = vrot.slane %v753_v45, %v3266_v33  ;;  %v776_v53 = vrot.slane %v768_v46, %v3266_v33  ;;  %v783_v56 = vrot.slane %v769_v49, %v3266_v33 }
 0x42f   : > { %v1486_v44 = vmul.f32 1.442695, %v1481_v34  ;;  %2996 = vpow2.f32 %v1484_v41 }
 0x430   : > { %v788_v50 = vpack.c.bf16 %v760_v47, %v760_v47  ;;  %v784_v51 = vcombine.high %v760_v47, %v3079_v1  ;;  %v785_v52 = vcombine.high %v767_v48, %v3079_v1  ;;  %v786_v5 = vcombine.high %v776_v53, %v3079_v1 }
 0x431   : > { %v790_v57 = vpack.c.bf16 %v767_v48, %v767_v48  ;;  %v787_v58 = vcombine.high %v783_v56, %v3079_v1  ;;  %v792_v59 = vpack.c.bf16 %v776_v53, %v776_v53  ;;  %v794_v61 = vpack.c.bf16 %v783_v56, %v783_v56 }
 0x432   : > { %1516 = vxpose.xlu1.c.b16.start.end [1/1] (short) (narrow) %v788_v50, 16  ;;  %v789_v54 = vpack.c.bf16 %v784_v51, %v784_v51  ;;  %v791_v55 = vpack.c.bf16 %v785_v52, %v785_v52  ;;  %v793_v9 = vpack.c.bf16 %v786_v5, %v786_v5  ;;  %2998 = vpow2.f32 %v1486_v44 }
 0x433   : > { %v795_v60 = vpack.c.bf16 %v787_v58, %v787_v58 }
 0x434   : > { %1532 = vxpose.xlu0.c.b16.start.end [1/1] (short) (narrow) %v789_v54, 16 }
 0x436   : > { %1564 = vxpose.xlu1.c.b16.start.end [1/1] (short) (narrow) %v791_v55, 16 }
 0x438   : > { %1548 = vxpose.xlu0.c.b16.start.end [1/1] (short) (narrow) %v790_v57, 16 }
 0x43a   : > { %1596 = vxpose.xlu1.c.b16.start.end [1/1] (short) (narrow) %v793_v9, 16 }
 0x43c   : > { %1580 = vxpose.xlu0.c.b16.start.end [1/1] (short) (narrow) %v792_v59, 16 }
 0x43e   : > { %1628 = vxpose.xlu1.c.b16.start.end [1/1] (short) (narrow) %v795_v60, 16 }
 0x440   : > { %1612 = vxpose.xlu0.c.b16.start.end [1/1] (short) (narrow) %v794_v61, 16 }
 0x450   : > { %v1476_v63 = vpop.xlane.xlu0 %1475 }
 0x451   : > { %v1482_v42 = vsub.f32 %v3365_v26, %v1476_v63 }
 0x453   : > { %v1488_v47 = vmul.f32 1.442695, %v1482_v42 }
 0x455   : > { %3000 = vpow2.f32 %v1488_v47 }
 0x458   : > { %v1479_v62 = vpop.xlane.xlu1 %1478 }
 0x459   : > { %v1483_v45 = vsub.f32 %v3369_v29, %v1479_v62  ;;  %v2997_v29 = vpop.eup %2996 }
 0x45a   : > { %v2999_v53 = vpop.eup %2998  ;;  %v1492_v54 = vsel %vm1282_vm3, %v2997_v29, 0.0 }
 0x45b   : > { %v1490_v26 = vmul.f32 1.442695, %v1483_v45  ;;  %v1495_v5 = vsel %vm1282_vm3, %v2999_v53, 0.0 }
 0x45d   : > { %3002 = vpow2.f32 %v1490_v26 }
 0x462   : > { %v3001_v55 = vpop.eup %3000 }
 0x463   : > { %v1498_v57 = vsel %vm1282_vm3, %v3001_v55, 0.0 }
 0x46a   : > { %v3003_v56 = vpop.eup %3002 }
 0x46b   : > { %v1501_v9 = vsel %vm1282_vm3, %v3003_v56, 0.0 }
 0x494   : > { %v1524_v0 = vpop.trf.xlu1 }
 0x496   : > { %v1540_v3 = vpop.trf.xlu0 }
 0x498   : > { %v1572_v4 = vpop.trf.xlu1 }
 0x49a   : > { %v1556_v6 = vpop.trf.xlu0 }
 0x49c   : > { %v1604_v7 = vpop.trf.xlu1 }
 0x49d   : > { %v1678_v13 = vcombine.low %v1540_v3, %v1604_v7 }
 0x49e   : > { %v1588_v8 = vpop.trf.xlu0 }
 0x49f   : > { %v1644_v16 = vcombine.low %v1524_v0, %v1588_v8  ;;  %v1685_v18 = vrot.slane %v1678_v13, %v3259_v21 }
 0x4a0   : > { %v1636_v14 = vpop.trf.xlu1 }
 0x4a1   : > { %v1686_v15 = vcombine.low %v1572_v4, %v1636_v14  ;;  %v1651_v22 = vrot.slane %v1644_v16, %v3259_v21 }
 0x4a2   : > { %v1620_v17 = vpop.trf.xlu0 }
 0x4a3   : > { %v1693_v19 = vrot.slane %v1686_v15, %v3259_v21  ;;  %v1652_v20 = vcombine.low %v1556_v6, %v1620_v17 }
 0x4a5   : > { %v1694_v23 = vcombine.low %v1685_v18, %v1693_v19  ;;  %v1659_v24 = vrot.slane %v1652_v20, %v3259_v21  ;;  %v1695_v11 = vcombine.high %v1685_v18, %v1693_v19 }
 0x4a7   : > { %v1660_v25 = vcombine.low %v1651_v22, %v1659_v24  ;;  %v1702_v28 = vrot.slane %v1694_v23, %v3266_v33  ;;  %v1661_v31 = vcombine.high %v1651_v22, %v1659_v24  ;;  %v1709_v46 = vrot.slane %v1695_v11, %v3266_v33 }
 0x4a9   : > { %v1668_v32 = vrot.slane %v1660_v25, %v3266_v33  ;;  %v1717_v36 = vshrl.u32 %v1702_v28, 16  ;;  %v1710_v40 = vcombine.high %v1702_v28, %v3087_v27  ;;  %v1675_v10 = vrot.slane %v1661_v31, %v3266_v33 }
 0x4aa   : > { %v1733_v51 = vshrl.u32 %v1709_v46, 16  ;;  %v1711_v59 = vcombine.high %v1709_v46, %v3087_v27 }
 0x4ab   : > { %v1714_v37 = vpack.i.b16 %v1702_v28, %v1668_v32  ;;  %v1716_v38 = vshrl.u32 %v1668_v32, 16  ;;  %v1676_v39 = vcombine.high %v1668_v32, %v3087_v27  ;;  %v1725_v35 = vshrl.u32 %v1710_v40, 16 }
 0x4ac   : > { %v1732_v49 = vshrl.u32 %v1675_v10, 16  ;;  %v1730_v50 = vpack.i.b16 %v1709_v46, %v1675_v10  ;;  %v1677_v58 = vcombine.high %v1675_v10, %v3087_v27  ;;  %v1741_v62 = vshrl.u32 %v1711_v59, 16 }
 0x4ad   : > { %1744 = vxpose.xlu0.c.b16.start.end [1/1] (short) (narrow) %v1714_v37, 16  ;;  %v1718_v43 = vpack.i.b16 %v1717_v36, %v1716_v38  ;;  %v1724_v2 = vshrl.u32 %v1676_v39, 16  ;;  %v1722_v12 = vpack.i.b16 %v1710_v40, %v1676_v39 }
 0x4ae   : > { %v1734_v52 = vpack.i.b16 %v1733_v51, %v1732_v49  ;;  %v1740_v60 = vshrl.u32 %v1677_v58, 16  ;;  %v1738_v61 = vpack.i.b16 %v1711_v59, %v1677_v58 }
 0x4af   : > { %1760 = vxpose.xlu1.c.b16.start.end [1/1] (short) (narrow) %v1718_v43, 16  ;;  %v1726_v48 = vpack.i.b16 %v1725_v35, %v1724_v2 }
 0x4b0   : > { %v1742_v63 = vpack.i.b16 %v1741_v62, %v1740_v60 }
 0x4b1   : > { %1776 = vxpose.xlu0.c.b16.start.end [1/1] (short) (narrow) %v1722_v12, 16 }
 0x4b3   : > { %1792 = vxpose.xlu1.c.b16.start.end [1/1] (short) (narrow) %v1726_v48, 16 }
 0x4b5   : > { %1808 = vxpose.xlu0.c.b16.start.end [1/1] (short) (narrow) %v1730_v50, 16 }
 0x4b7   : > { %1824 = vxpose.xlu1.c.b16.start.end [1/1] (short) (narrow) %v1734_v52, 16 }
 0x4c2   : > { %1493 = vadd.xlane.f32.xlu0 %v1492_v54 }
 0x4c4   : > { %1496 = vadd.xlane.f32.xlu1 %v1495_v5 }
 0x4c6   : > { %1499 = vadd.xlane.f32.xlu0 %v1498_v57 }
 0x4c8   : > { %1502 = vadd.xlane.f32.xlu1 %v1501_v9 }
 0x4f3   : > { %1840 = vxpose.xlu0.c.b16.start.end [1/1] (short) (narrow) %v1738_v61, 16 }
 0x4f5   : > { %1856 = vxpose.xlu1.c.b16.start.end [1/1] (short) (narrow) %v1742_v63, 16 }
 0x50f   : > { %v1752_v0 = vpop.trf.xlu0 }
 0x511   : > { %v1768_v3 = vpop.trf.xlu1 }
 0x513   : > { %v1784_v4 = vpop.trf.xlu0 }
 0x515   : > { %v1800_v6 = vpop.trf.xlu1 }
 0x517   : > { %v1816_v7 = vpop.trf.xlu0 }
 0x518   : > { %v1872_v20 = vcombine.low %v1752_v0, %v1816_v7 }
 0x519   : > { %v1832_v8 = vpop.trf.xlu1 }
 0x51a   : > { %v1897_v18 = vcombine.low %v1768_v3, %v1832_v8  ;;  %v1879_v34 = vrot.slane %v1872_v20, %v3259_v21 }
 0x51c   : > { %v1904_v28 = vrot.slane %v1897_v18, %v3259_v21 }
 0x54b   : > { %v1494_v13 = vpop.xlane.xlu0 %1493 }
 0x54c   : > { %3004 = vrcp.f32 %v1494_v13  ;;  %v469_v13 = vld [vmem:[%s463_s21] sm:$0xff]  ;;  %s3091_s21 = smov 24  }
 0x54d   : > { %v1497_v14 = vpop.xlane.xlu1 %1496  ;;  %vm470_vm4 = vcmp.gt.f32.partialorder %v469_v13, 0.5 }
 0x54e   : > { %3006 = vrcp.f32 %v1497_v14  ;;  %v2399_v14 = vsel %vm470_vm4, 1, %v3087_v27 }
 0x54f   : > { %v1500_v16 = vpop.xlane.xlu0 %1499 }
 0x550   : > { %3008 = vrcp.f32 %v1500_v16 }
 0x551   : > { %v1503_v15 = vpop.xlane.xlu1 %1502 }
 0x552   : > { %3010 = vrcp.f32 %v1503_v15 }
 0x555   : > { %v1848_v17 = vpop.trf.xlu0 }
 0x556   : > { %v1880_v19 = vcombine.low %v1784_v4, %v1848_v17 }
 0x557   : > { %v1864_v22 = vpop.trf.xlu1 }
 0x558   : > { %v1905_v23 = vcombine.low %v1800_v6, %v1864_v22  ;;  %v1887_v25 = vrot.slane %v1880_v19, %v3259_v21 }
 0x559   : > { %v3005_v24 = vpop.eup %3004 }
 0x55a   : > { %v1912_v30 = vrot.slane %v1905_v23, %v3259_v21  ;;  %v1508_v31 = vmul.f32 %v3005_v24, %v2997_v29  ;;  %v1888_v39 = vcombine.low %v1879_v34, %v1887_v25 }
 0x55b   : > { %v3007_v32 = vpop.eup %3006 }
 0x55c   : > { %v1913_v11 = vcombine.low %v1904_v28, %v1912_v30  ;;  %v1512_v36 = vpack.c.bf16 %v1508_v31, %v1508_v31  ;;  %v1509_v37 = vmul.f32 %v3007_v32, %v2999_v53  ;;  %v1895_v10 = vrot.slane %v1888_v39, %v3266_v33 }
 0x55d   : > { %v3009_v38 = vpop.eup %3008 }
 0x55e   : > { %v1938_v40 = vsel %vm1282_vm3, %v1512_v36, 0  ;;  %v1920_v42 = vrot.slane %v1913_v11, %v3266_v33  ;;  %v1513_v43 = vpack.c.bf16 %v1509_v37, %v1509_v37  ;;  %v1510_v2 = vmul.f32 %v3009_v38, %v3001_v55  ;;  %v2988_v11 = vld [vmem:[%s3573_s4 + $0x8] sm:$0xff]  }
 0x55f   : > { %v3011_v41 = vpop.eup %3010  ;;  %2881 = vmatpush3.bf16.xpose.msra.mxu0 %v1938_v40  ;;  %v1925_v47 = vshrl.u32 %v1895_v10, 16  ;;  %v1896_v51 = vcombine.high %v1895_v10, %v3087_v27 }
 0x560   : > { %2892 = vmatprep.subr.bf16.mxu0 %v3079_v1  ;;  %v1984_v44 = vsel %vm1282_vm3, %v1513_v43, 0  ;;  %v1511_v45 = vmul.f32 %v3011_v41, %v3003_v56  ;;  %v1514_v12 = vpack.c.bf16 %v1510_v2, %v1510_v2  ;;  %v1926_v35 = vshrl.u32 %v1920_v42, 16 }
 0x561   : > { %2887 = vmatpush3.bf16.xpose.msra.mxu1 %v1984_v44  ;;  %v1924_v46 = vpack.i.b16 %v1920_v42, %v1895_v10  ;;  %v1921_v26 = vcombine.high %v1920_v42, %v3087_v27  ;;  %v1931_v54 = vshrl.u32 %v1896_v51, 16 }
 0x562   : > { %2898 = vmatprep.subr.bf16.mxu1 %v3079_v1  ;;  %v1515_v48 = vpack.c.bf16 %v1511_v45, %v1511_v45  ;;  %v2030_v49 = vsel %vm1282_vm3, %v1514_v12, 0  ;;  %v1927_v50 = vpack.i.b16 %v1926_v35, %v1925_v47  ;;  %v2989_v12 = vld [vmem:[%s3573_s4] sm:$0xff]  }
 0x563   : > { %v1932_v29 = vshrl.u32 %v1921_v26, 16  ;;  %v1930_v53 = vpack.i.b16 %v1921_v26, %v1896_v51 }
 0x564   : > { %v2076_v52 = vsel %vm1282_vm3, %v1515_v48, 0 }
 0x565   : > { %v1933_v55 = vpack.i.b16 %v1932_v29, %v1931_v54 }
 0x566   : > { %2883 = vmatmul.mubr.msk.bf16.vlgmr.msra.gmra.mxu0 %vm1282_vm3, %v1924_v46 }
 0x567   : > { %2893 = vmatpush3.bf16.xpose.msra.mxu0 %v2030_v49  ;;  %2894 = vmatprep.mubr.msk.bf16.mxu0 %vm3080_vm0, %v3079_v1 }
 0x568   : > { %2904 = vmatprep.subr.bf16.mxu0 %v3079_v1  ;;  %2889 = vmatmul.mubr.msk.bf16.vlgmr.msra.gmra.mxu1 %vm1282_vm3, %v1927_v50 }
 0x569   : > { %2899 = vmatpush3.bf16.xpose.msra.mxu1 %v2076_v52  ;;  %2900 = vmatprep.mubr.msk.bf16.mxu1 %vm3080_vm0, %v3079_v1 }
 0x56a   : > { %2912 = vmatprep.subr.bf16.mxu1 %v3079_v1 }
 0x56e   : > { %2895 = vmatmul.mubr.msk.bf16.vlgmr.msra.gmra.mxu0 %vm1282_vm3, %v1930_v53 }
 0x56f   : > { %2908 = vmatprep.mubr.msk.bf16.mxu0 %vm3080_vm0, %v3079_v1  ;;  %2905 = vmatpush3.bf16.msra.mxu0 %v2988_v11  ;;  %v2802_v11 = vld [vmem:[%s3575_s6] ss:$0 sm:$0xff] }
 0x570   : > { %2901 = vmatmul.mubr.msk.bf16.vlgmr.msra.gmra.mxu1 %vm1282_vm3, %v1933_v55  ;;  %2906 = vmatprep.subr.bf16.mxu0 %v3079_v1 }
 0x571   : > { %2916 = vmatprep.mubr.msk.bf16.mxu1 %vm3080_vm0, %v3079_v1 }
 0x573   : > { %2907 = vmatpush3.bf16.msra.mxu0 %v2989_v12 }
 0x574   : > { %2920 = vmatprep.subr.bf16.mxu0 %v3079_v1 }
 0x626   : > { %v1974_v5 = vpop.f32.mrf.mxu0 }
 0x627   : > { %2118 = vxpose.xlu0.b32.start.end [1/1] (short) (narrow) %v1974_v5, 8 }
 0x628   : > { %v2884_v56 = vpop.f32.mrf.mxu0  ;;  %v2020_v57 = vpop.f32.mrf.mxu1 }
 0x629   : > { %2150 = vxpose.xlu1.b32.start.end [1/1] (short) (narrow) %v2020_v57, 8 }
 0x62a   : > { %v1977_v9 = vpop.f32.mrf.mxu0  ;;  %v2890_v58 = vpop.f32.mrf.mxu1 }
 0x62c   : > { %v2885_v59 = vpop.f32.mrf.mxu0  ;;  %v2023_v60 = vpop.f32.mrf.mxu1 }
 0x62e   : > { %v2066_v61 = vpop.f32.mrf.mxu0  ;;  %v2891_v62 = vpop.f32.mrf.mxu1 }
 0x62f   : > { %2182 = vxpose.xlu0.b32.start.end [1/1] (short) (narrow) %v2066_v61, 8  ;;  %v3016_v61 = vld [vmem:[%s3234_s20] sm:$0xff]  ;;  %s2815_s20 = sshll.u32 %s3184_s29, 7  ;;  %s3092_s29 = smov [#allocation2]  }
 0x630   : > { %v2896_v63 = vpop.f32.mrf.mxu0  ;;  %v2112_v0 = vpop.f32.mrf.mxu1  ;;  %s3531_s3 = scalar_lea.hbm %s3582_s13, %s2815_s20 }
 0x632   : > { %v2069_v3 = vpop.f32.mrf.mxu0  ;;  %v2902_v4 = vpop.f32.mrf.mxu1 }
 0x633   : > { %2214 = vxpose.xlu0.b32.start.end [1/1] (short) (narrow) %v2112_v0, 8 }
 0x634   : > { %v2897_v6 = vpop.f32.mrf.mxu0  ;;  %v2115_v7 = vpop.f32.mrf.mxu1 }
 0x636   : > { %v2903_v8 = vpop.f32.mrf.mxu1 }
 0x647   : > { %2984 = vset.pattern.permute.xlu1 %v3087_v27 }
 0x648   : > { %2401 = vperm.xlu1 %2984, %v2399_v14  }
 0x65c   : > { %2985 = vset.pattern.permute.xlu0 %v3087_v27 }
 0x6a3   : > { %v2134_v16 = vpop.trf.xlu0 }
 0x6a5   : > { %v2166_v17 = vpop.trf.xlu1 }
 0x6ab   : > { %v2198_v15 = vpop.trf.xlu0 }
 0x6ac   : > { %v2246_v18 = vcombine.low %v2134_v16, %v2198_v15  ;;  %v2247_v19 = vcombine.high %v2134_v16, %v2198_v15  ;;  %v2990_v16 = vld [vmem:[%s3574_s5 + $0x8] sm:$0xff]   ;;  %v2991_v15 = vld [vmem:[%s3574_s5] sm:$0xff]  }
 0x6ad   : > { %2913 = vmatpush3.bf16.msra.mxu1 %v2990_v16 }
 0x6ae   : > { %v2254_v24 = vrot.slane %v2246_v18, %v3259_v21  ;;  %v2261_v25 = vrot.slane %v2247_v19, %v3259_v21  ;;  %2914 = vmatprep.subr.bf16.mxu1 %v3079_v1  ;;  %v2993_v18 = vld [vmem:[%s3576_s7 + $0x10] sm:$0xff]  }
 0x6af   : > { %v2230_v20 = vpop.trf.xlu0 }
 0x6b0   : > { %v2262_v22 = vcombine.low %v2166_v17, %v2230_v20  ;;  %v2263_v23 = vcombine.high %v2166_v17, %v2230_v20  ;;  %v2992_v17 = vld [vmem:[%s3576_s7 + $0x18] sm:$0xff]  }
 0x6b1   : > { %2915 = vmatpush3.bf16.msra.mxu1 %v2991_v15 }
 0x6b2   : > { %v2270_v28 = vrot.slane %v2262_v22, %v3259_v21  ;;  %v2277_v30 = vrot.slane %v2263_v23, %v3259_v21 }
 0x6b4   : > { %v2278_v31 = vcombine.low %v2254_v24, %v2270_v28  ;;  %v2279_v32 = vcombine.high %v2254_v24, %v2270_v28  ;;  %v2294_v34 = vcombine.low %v2261_v25, %v2277_v30  ;;  %v2295_v27 = vcombine.high %v2261_v25, %v2277_v30  ;;  %v2800_v24 = vld [vmem:[%s3578_s9] ss:$0 sm:$0xff] }
 0x6b5   : > { %v2801_v28 = vld [vmem:[%s3579_s10] ss:$0 sm:$0xff] }
 0x6b6   : > { %v2286_v36 = vrot.slane %v2278_v31, %v3266_v33  ;;  %v2293_v37 = vrot.slane %v2279_v32, %v3266_v33  ;;  %v2302_v38 = vrot.slane %v2294_v34, %v3266_v33  ;;  %v2309_v39 = vrot.slane %v2295_v27, %v3266_v33  ;;  %v2994_v34 = vld [vmem:[%s3576_s7 + $0x8] sm:$0xff]   ;;  %v2995_v27 = vld [vmem:[%s3576_s7] sm:$0xff]  }
 0x6b8   : > { %v2314_v40 = vcombine.low %v2286_v36, %v2293_v37  ;;  %v2795_v41 = vcombine.high %v2286_v36, %v2293_v37  ;;  %v2330_v42 = vcombine.low %v2302_v38, %v2309_v39  ;;  %v2796_v43 = vcombine.high %v2302_v38, %v2309_v39 }
 0x6ba   : > { %v2321_v2 = vrot.slane %v2314_v40, %v3259_v21  ;;  %v2329_v10 = vrot.slane %v2795_v41, %v3259_v21  ;;  %v2337_v44 = vrot.slane %v2330_v42, %v3259_v21  ;;  %v2345_v45 = vrot.slane %v2796_v43, %v3259_v21 }
 0x6bc   : > { %v2347_v35 = vcombine.high %v2321_v2, %v2329_v10  ;;  %v2363_v46 = vcombine.high %v2337_v44, %v2345_v45  ;;  %v2346_v47 = vcombine.low %v2321_v2, %v2329_v10  ;;  %v2362_v48 = vcombine.low %v2337_v44, %v2345_v45 }
 0x6be   : > { %v2361_v49 = vrot.slane %v2347_v35, %v3266_v33  ;;  %v2377_v26 = vrot.slane %v2363_v46, %v3266_v33  ;;  %v2354_v50 = vrot.slane %v2346_v47, %v3266_v33  ;;  %v2370_v51 = vrot.slane %v2362_v48, %v3266_v33 }
 0x6c0   : > { %v2380_v21 = vcombine.low %v2361_v49, %v2377_v26  ;;  %v2379_v52 = vcombine.high %v2354_v50, %v2370_v51  ;;  %v2378_v29 = vcombine.low %v2354_v50, %v2370_v51  ;;  %v2381_v53 = vcombine.high %v2361_v49, %v2377_v26 }
 0x6c2   : > { %2387 = vrot.lane.b32.xlu1 %v2380_v21, %s3089_s15  ;;  %2383 = vrot.lane.b32.xlu0 %v2379_v52, %s3090_s16  ;;  %s2777_s15 = sshll.u32 %s453_s23, 3  ;;  %s2680_s16 = scalar_lea.sflag [#allocation3], %s453_s23 }
 0x6c3   : > { %v3471_v54 = vpop.permute.xlu1 %2401  ;;  %s455_s22 = scalar_lea.vmem [#allocation2], %s2777_s15  ;;  %s3021_s15 = sshll.u32 %s3092_s29, 4  ;;  %s3022_s15 = int_to_ptr.vmem [resolvable:$false] %s3021_s15 }
 0x6c4   : > { %vm2403_vm7 = vcmp.eq.s32.totalorder %v3471_v54, 1  ;;  %s2693_s0 = sshll.u32 %s455_s22, 4  ;;  %s3023_s24 = scalar_lea.vmem %s3022_s15, 256  ;;  %s2694_s0 = int_to_ptr.vmem [resolvable:$true] %s2693_s0 }
 0x6c5   : > { %p3024_p0 = scmp.lt.s32.totalorder %s2694_s0, %s3022_s15 }
 0x6c6   : > { %2391 = vrot.lane.b32.xlu1 %v2381_v53, %s3091_s21  ;;  %s3017_s21 = scalar_lea.vmem %s2694_s0, 128 }
 0x6c7   : > { %p3018_p11 = scmp.ne.s32.totalorder %s2694_s0, %s3017_s21  ;;  %p3025_p1 = scmp.lt.s32.totalorder %s3023_s24, %s3017_s21 }
 0x6c9   : > { %p3019_p12 = pnand %p3018_p11, %p3201_p5  ;;  %p3026_p2 = por %p3025_p1, %p3024_p0 }
 0x6cb   : > { %p3020_p13 = pneg %p3019_p12 }
 0x6cd   : > { %p3027_p3 = pnand %p3026_p2, %p3020_p13 }
 0x734   : > { %v2388_v55 = vpop.permute.xlu1 %2387  ;;  %v2384_v5 = vpop.permute.xlu0 %2383 }
 0x735   : > { %v2394_v56 = vsel %vm1282_vm3, %v2378_v29, %v2384_v5  ;;  %v2812_v29 = vld [vmem:[%s3580_s11] ss:$0 sm:$0xff] }
 0x736   : > { %v2396_v57 = vsel %vm2395_vm5, %v2394_v56, %v2388_v55  ;;  %v2813_v55 = vld [vmem:[%s3581_s12] ss:$0 sm:$0xff] }
 0x738   : > { %v2392_v33 = vpop.permute.xlu1 %2391 }
 0x739   : > { %v2398_v9 = vsel %vm2397_vm6, %v2396_v57, %v2392_v33 }
 0x73a   : > { %v2404_v58 = vsel %vm2403_vm7, 0.0, %v2398_v9 }
 0x73b   : > { %v2405_v59 = vpack.c.bf16 %v2404_v58, %v2404_v58 }
 0x73d   : > { %2909 = vmatmul.mubr.msk.bf16.vlgmr.msra.gmra.mxu0 %vm490_vm1, %v2405_v59 }
 0x73e   : > { %2928 = vmatprep.mubr.msk.bf16.mxu0 %vm3080_vm0, %v3079_v1  ;;  %2921 = vmatpush3.bf16.msra.mxu0 %v2992_v17 }
 0x73f   : > { %2922 = vmatprep.subr.bf16.mxu0 %v3079_v1 }
 0x742   : > { %2923 = vmatpush3.bf16.msra.mxu0 %v2993_v18 }
 0x743   : > { %2924 = vmatprep.subr.bf16.mxu0 %v3079_v1 }
 0x746   : > { %2925 = vmatpush3.bf16.msra.mxu0 %v2994_v34 }
 0x747   : > { %2926 = vmatprep.subr.bf16.mxu0 %v3079_v1  ;;  %v2806_v1 = vld [vmem:[%s3577_s8] ss:$0 sm:$0xff] }
 0x74a   : > { %2927 = vmatpush3.bf16.msra.mxu0 %v2995_v27 }
 0x7fd   : > { %v2459_v60 = vpop.f32.mrf.mxu0 }
 0x7fe   : > { %v2460_v62 = vadd.f32 %v3016_v61, %v2459_v60 }
 0x7ff   : > { %v2910_v63 = vpop.f32.mrf.mxu0 }
 0x800   : > { %v2465_v0 = vsel %vm490_vm1, %v2460_v62, 0.0 }
 0x801   : > { %2466 = vadd.xlane.f32.xlu1 %v2465_v0  ;;  %v2462_v3 = vpop.f32.mrf.mxu0 }
 0x803   : > { %v2911_v4 = vpop.f32.mrf.mxu0 }
 0x88a   : > { %v2467_v6 = vpop.xlane.xlu1 %2466 }
 0x88b   : > { %v2469_v7 = vmul.f32 0.03125, %v2467_v6 }
 0x88d   : > { %v2470_v8 = vsub.f32 %v2460_v62, %v2469_v7 }
 0x88f   : > { %v2471_v13 = vmul.f32 %v2470_v8, %v2470_v8 }
 0x891   : > { %v2472_v14 = vsel %vm490_vm1, %v2471_v13, 0.0 }
 0x892   : > { %2473 = vadd.xlane.f32.xlu0 %v2472_v14 }
 0x91b   : > { %v2474_v19 = vpop.xlane.xlu0 %2473 }
 0x91c   : > { %v2475_v20 = vmul.f32 0.03125, %v2474_v19 }
 0x91e   : > { %v2476_v22 = vadd.f32 1e-05, %v2475_v20 }
 0x920   : > { %3012 = vrsqrt.f32 %v2476_v22 }
 0x92d   : > { %v3013_v23 = vpop.eup %3012 }
 0x92e   : > { %v2478_v25 = vmul.f32 %v3013_v23, %v2470_v8 }
 0x930   : > { %v2486_v30 = vmul.f32 %v2800_v24, %v2478_v25 }
 0x932   : > { %v2494_v31 = vadd.f32 %v2801_v28, %v2486_v30 }
 0x934   : > { %v2495_v32 = vpack.c.bf16 %v2494_v31, %v2494_v31 }
 0x936   : > { %2917 = vmatmul.mubr.msk.bf16.vlgmr.msra.gmra.mxu1 %vm490_vm1, %v2495_v32 }
 0x9f6   : > { %v2556_v36 = vpop.f32.mrf.mxu1 }
 0x9f7   : > { %v2557_v37 = vadd.f32 %v2802_v11, %v2556_v36 }
 0x9f8   : > { %v2918_v38 = vpop.f32.mrf.mxu1 }
 0x9f9   : > { %v2562_v39 = vmax.f32 %v2557_v37, 0.0 }
 0x9fa   : > { %v2559_v40 = vpop.f32.mrf.mxu1 }
 0x9fb   : > { %v2563_v41 = vpack.c.bf16 %v2562_v39, %v2562_v39 }
 0x9fc   : > { %v2919_v42 = vpop.f32.mrf.mxu1 }
 0x9fd   : > { %2929 = vmatmul.mubr.msk.bf16.vlgmr.msra.gmra.mxu0 %vm2603_vm8, %v2563_v41 }
 0xabd   : > { %v2641_v43 = vpop.f32.mrf.mxu0 }
 0xabe   : > { %v2642_v2 = vadd.f32 %v2806_v1, %v2641_v43 }
 0xabf   : > { %v2930_v10 = vpop.f32.mrf.mxu0 }
 0xac0   : > { %v2647_v44 = vadd.f32 %v2642_v2, %v2494_v31 }
 0xac1   : > { %v2644_v45 = vpop.f32.mrf.mxu0 }
 0xac2   : > { %v2648_v12 = vsel %vm490_vm1, %v2647_v44, 0.0 }
 0xac3   : > { %2649 = vadd.xlane.f32.xlu0 %v2648_v12  ;;  %v2931_v35 = vpop.f32.mrf.mxu0 }
 0xb4c   : > { %v2650_v46 = vpop.xlane.xlu0 %2649 }
 0xb4d   : > { %v2651_v47 = vmul.f32 0.03125, %v2650_v46 }
 0xb4f   : > { %v2652_v48 = vsub.f32 %v2647_v44, %v2651_v47 }
 0xb51   : > { %v2653_v49 = vmul.f32 %v2652_v48, %v2652_v48 }
 0xb53   : > { %v2654_v26 = vsel %vm490_vm1, %v2653_v49, 0.0 }
 0xb54   : > { %2655 = vadd.xlane.f32.xlu1 %v2654_v26 }
 0xbdd   : > { %v2656_v50 = vpop.xlane.xlu1 %2655 }
 0xbde   : > { %v2657_v51 = vmul.f32 0.03125, %v2656_v50 }
 0xbe0   : > { %v2658_v21 = vadd.f32 1e-05, %v2657_v51 }
 0xbe2   : > { %3014 = vrsqrt.f32 %v2658_v21 }
 0xbef   : > { %v3015_v52 = vpop.eup %3014 }
 0xbf0   : > { %v2660_v53 = vmul.f32 %v3015_v52, %v2652_v48 }
 0xbf2   : > { %v2668_v5 = vmul.f32 %v2812_v29, %v2660_v53 }
 0xbf4   : > { %v2676_v56 = vadd.f32 %v2813_v55, %v2668_v5 }
 0xbf6   : > { %v2677_v33 = vsel %vm2403_vm7, 0.0, %v2676_v56 }
 0xbf7   : > { %2678 = vst.msk [vmem:[%s455_s22] sm:$0xff] %vm490_vm1, %v2677_v33 }
 0xbf8   : > { %3030 = shalt.err (!%p3027_p3)
}
 0xbf9   : > { %s3031_s1 = scalar_lea.hbm %s3531_s3, 128  ;;  %s3035_s30 = scalar_lea.hbm %s3582_s13, 256 }
 0xbfa   : > { %p3032_p4 = scmp.ne.s32.totalorder %s3531_s3, %s3031_s1  ;;  %p3036_p9 = scmp.lt.s32.totalorder %s3531_s3, %s3582_s13 }
 0xbfb   : > { %p3037_p10 = scmp.lt.s32.totalorder %s3035_s30, %s3031_s1 }
 0xbfc   : > { %p3033_p7 = pnand %p3032_p4, %p3201_p5 }
 0xbfd   : > { %p3038_p11 = por %p3037_p10, %p3036_p9 }
 0xbfe   : > { %p3034_p8 = pneg %p3033_p7 }
 0xc00   : > { %p3039_p12 = pnand %p3038_p11, %p3034_p8 }
 0xc02   : > { %3042 = shalt.err (!%p3039_p12)
}
 0xc03   : > { %2932 = dma.vmem_to_hbm [thread:$0]  (%p3201_p5), %s2694_s0, 128, %s3531_s3, %s2680_s16  }
 0xc04 PF: > { %p2938_p13 = scmp.ge.s32.totalorder %s3077_s28, 2  ;;  %s2705_s21 = sand.u32 1, %s3065_s25  }
 0xc05   : > { %s2706_s29 = scalar_lea.sflag [#allocation3], %s2705_s21 }
 0xc06   : > { %p2935_p0 = pnand %p2938_p13, %p3205_p6 }
 0xc08   : > { %p2936_p1 = pneg %p2935_p0 }
 0xc0a   : > { %3060 = dma.done.wait (%p2936_p1), %s2706_s29, 128  }
 0xc0b   : > { %3062 = vsyncadd (%p2936_p1), %s2706_s29, 4294967168  ;;  %p23_p2 = scmp.ge.s32.totalorder %s3188_s14, 4   ;;  %s3593_s25 = smov %s3069_s26 }
 0xc0c   : > { %s3594_s26 = smov %s3073_s27  ;;  %s3595_s27 = smov %s3199_s17 }
 0xc0d   : > { %s3596_s28 = smov %s3188_s14  ;;  %25 = sbr.rel (!%p23_p2) target bundleno = 8 (0x8), region = 113 }
 0xc12   :  { %2711 = vsyncpa [#allocation3], 1 }
 0xc13   :  { %2713 = vsyncpa [#allocation3 + $0x1], 1 }

</bundles_post_ra>
